<compile_context>
chip_gen: v7x
topology: tpu7x:2x2x1
jax: 0.10.0
libtpu: 0.0.40
codegen_flags: <defaults>
</compile_context>

<pallas_src>
import jax
import jax.numpy as jnp
import numpy as np
from jax.experimental import pallas as pl
from jax.experimental.pallas import tpu as pltpu


def _roundup(n, m):
    return ((n + m - 1) // m) * m


# --------------------------------------------------------------------------- #
# Packed-weight slab layout (static, derived from shapes only)
# --------------------------------------------------------------------------- #
def _slab_layout(D, H, O, num_layers):
    lanes = _roundup(max(4 * H, O), 128)
    cur = 0
    offs = []

    def blk(nrows):
        nonlocal cur
        off = cur
        cur += _roundup(nrows, 8)          # keep every block sublane-aligned
        return off

    for layer in range(num_layers):
        d_in = D if layer == 0 else H
        offs.append((blk(d_in), blk(H), blk(1)))   # (w_ih, w_hh, bias) row offsets
    lin_w_off = blk(H)
    lin_b_off = blk(1)
    return offs, lin_w_off, lin_b_off, cur, lanes


# --------------------------------------------------------------------------- #
# Fused Pallas kernel (all LSTM layers + Linear, single invocation, no grid)
# --------------------------------------------------------------------------- #
def _make_fused_lstm_kernel(T, BP, D, H, num_layers, offs, lin_w_off, lin_b_off):
    G4 = 4 * H

    def lstm_cell(gates, c_prev):
        sig = jax.nn.sigmoid(gates)                 # one pass over the 4H vreg
        i_g = sig[:, 0 * H:1 * H]
        f_g = sig[:, 1 * H:2 * H]
        o_g = sig[:, 3 * H:4 * H]
        g_g = jnp.tanh(gates[:, 2 * H:3 * H])
        c_new = f_g * c_prev + i_g * g_g
        h_new = o_g * jnp.tanh(c_new)
        return h_new, c_new

    def kernel(x_ref, slab_ref, out_ref, xw_s):
        # ---- layer 0: hoisted input projection, ONE big MXU matmul ---------
        o_ih0, o_hh0, o_b0 = offs[0]
        w_ih0 = slab_ref[o_ih0:o_ih0 + D, :G4]
        b0 = slab_ref[o_b0:o_b0 + 1, :G4]
        xw = jnp.dot(x_ref[...], w_ih0, preferred_element_type=jnp.float32) + b0
        xw_s[...] = xw.reshape(T, BP, G4)           # stage for aligned per-step reads

        whh0 = slab_ref[o_hh0:o_hh0 + H, :G4]       # loaded once, reused every step

        # ---- layer 0 recurrence (fully unrolled, T static & small) ---------
        h_seq = []
        h_prev = jnp.zeros((BP, H), jnp.float32)
        c_prev = jnp.zeros((BP, H), jnp.float32)
        for t in range(T):
            gates = xw_s[t] + jnp.dot(h_prev, whh0,
                                      preferred_element_type=jnp.float32)
            h_prev, c_prev = lstm_cell(gates, c_prev)
            h_seq.append(h_prev)

        # ---- layers >= 1: per-step fused input+hidden projection -----------
        # (fine-grained deps -> scheduler wavefront-interleaves with layer l-1)
        for layer in range(1, num_layers):
            o_ih, o_hh, o_b = offs[layer]
            wih = slab_ref[o_ih:o_ih + H, :G4]
            whh = slab_ref[o_hh:o_hh + H, :G4]
            b = slab_ref[o_b:o_b + 1, :G4]

            new_seq = []
            h_prev = jnp.zeros((BP, H), jnp.float32)
            c_prev = jnp.zeros((BP, H), jnp.float32)
            for t in range(T):
                gates = (
                    jnp.dot(h_seq[t], wih, preferred_element_type=jnp.float32)
                    + jnp.dot(h_prev, whh, preferred_element_type=jnp.float32)
                    + b
                )
                h_prev, c_prev = lstm_cell(gates, c_prev)
                new_seq.append(h_prev)
            h_seq = new_seq

        # ---- final Linear fused in the same kernel, lane-dense output ------
        h_all = jnp.concatenate(h_seq, axis=0)                      # (T*BP, H)
        lin_w = slab_ref[lin_w_off:lin_w_off + H, :]                # (H, LANES) zero-padded
        lin_b = slab_ref[lin_b_off:lin_b_off + 1, :]                # (1, LANES)
        out_ref[...] = (
            jnp.dot(h_all, lin_w, preferred_element_type=jnp.float32) + lin_b
        )

    return kernel


# --------------------------------------------------------------------------- #
# Wrapper
# --------------------------------------------------------------------------- #
@jax.jit
def lstm_forward_pallas(x, params):
    """x: (T, B, input_dim) -> (T, B, output_dim), matching nn.LSTM + nn.Linear."""
    T, B, D = x.shape
    H = params["lstm"][0][1].shape[0]
    O = params["lin_w_t"].shape[1]
    num_layers = len(params["lstm"])

    BP = max(8, _roundup(B, 8))              # pad batch to the sublane width
    TB = T * BP

    # ---- pad batch rows (zero rows are independent; sliced off afterwards) --
    x_pad = jnp.zeros((T, BP, D), jnp.float32).at[:, :B, :].set(x)
    x_flat = x_pad.reshape(TB, D)

    # ---- pack all weights & biases into one padded (rows, LANES) slab -------
    offs, lin_w_off, lin_b_off, total_rows, lanes = _slab_layout(D, H, O, num_layers)
    slab = jnp.zeros((total_rows, lanes), jnp.float32)
    for layer, (w_ih_t, w_hh_t, b) in enumerate(params["lstm"]):
        o_ih, o_hh, o_b = offs[layer]
        slab = slab.at[o_ih:o_ih + w_ih_t.shape[0], :4 * H].set(w_ih_t)
        slab = slab.at[o_hh:o_hh + H, :4 * H].set(w_hh_t)
        slab = slab.at[o_b:o_b + 1, :4 * H].set(b)
    slab = slab.at[lin_w_off:lin_w_off + H, :O].set(params["lin_w_t"])
    slab = slab.at[lin_b_off:lin_b_off + 1, :O].set(params["lin_b"])

    out_padded = pl.pallas_call(
        _make_fused_lstm_kernel(T, BP, D, H, num_layers, offs, lin_w_off, lin_b_off),
        out_shape=jax.ShapeDtypeStruct((TB, lanes), jnp.float32),
        in_specs=[
            pl.BlockSpec((TB, D), lambda: (0, 0)),
            pl.BlockSpec((total_rows, lanes), lambda: (0, 0)),
        ],
        out_specs=pl.BlockSpec((TB, lanes), lambda: (0, 0)),
        scratch_shapes=[pltpu.VMEM((T, BP, 4 * H), jnp.float32)],
        compiler_params=pltpu.CompilerParams(
            vmem_limit_bytes=16 * 1024 * 1024,   # tiny problem; well under limit
        ),
    )(x_flat, slab)

    return out_padded.reshape(T, BP, lanes)[:, :B, :O]


# --------------------------------------------------------------------------- #
# Pure-JAX reference (mirrors torch.nn.LSTM + nn.Linear semantics)
# --------------------------------------------------------------------------- #
def lstm_forward_ref(x, params):
    h = x
    for (w_ih_t, w_hh_t, b) in params["lstm"]:
        T, B, _ = h.shape
        H = w_hh_t.shape[0]

        def step(carry, x_t):
            h_prev, c_prev = carry
            gates = x_t @ w_ih_t + h_prev @ w_hh_t + b
            i_g = jax.nn.sigmoid(gates[:, 0 * H:1 * H])
            f_g = jax.nn.sigmoid(gates[:, 1 * H:2 * H])
            g_g = jnp.tanh(gates[:, 2 * H:3 * H])
            o_g = jax.nn.sigmoid(gates[:, 3 * H:4 * H])
            c_new = f_g * c_prev + i_g * g_g
            h_new = o_g * jnp.tanh(c_new)
            return (h_new, c_new), h_new

        init = (jnp.zeros((B, H), jnp.float32), jnp.zeros((B, H), jnp.float32))
        _, h = jax.lax.scan(step, init, h)
    return h @ params["lin_w_t"] + params["lin_b"]


# --------------------------------------------------------------------------- #
# Deterministic parameter init (same shapes as nn.LSTM / nn.Linear)
# --------------------------------------------------------------------------- #
def init_params(key, input_dim, hidden_dim, output_dim, num_layers):
    scale = 1.0 / np.sqrt(hidden_dim)
    params = {"lstm": []}
    for layer in range(num_layers):
        d_in = input_dim if layer == 0 else hidden_dim
        key, k1, k2, k3, k4 = jax.random.split(key, 5)
        # PyTorch stores weight_ih (4H, d_in); we keep the transpose for matmul.
        w_ih_t = jax.random.uniform(k1, (d_in, 4 * hidden_dim), jnp.float32, -scale, scale)
        w_hh_t = jax.random.uniform(k2, (hidden_dim, 4 * hidden_dim), jnp.float32, -scale, scale)
        b_ih = jax.random.uniform(k3, (4 * hidden_dim,), jnp.float32, -scale, scale)
        b_hh = jax.random.uniform(k4, (4 * hidden_dim,), jnp.float32, -scale, scale)
        params["lstm"].append((w_ih_t, w_hh_t, (b_ih + b_hh).reshape(1, -1)))
    key, k5, k6 = jax.random.split(key, 3)
    lscale = 1.0 / np.sqrt(hidden_dim)
    params["lin_w_t"] = jax.random.uniform(k5, (hidden_dim, output_dim), jnp.float32, -lscale, lscale)
    params["lin_b"] = jax.random.uniform(k6, (1, output_dim), jnp.float32, -lscale, lscale)
    return params


# --------------------------------------------------------------------------- #
if __name__ == "__main__":
    T, B = 8, 4                 # (m, K) in the module docstring
    input_dim, hidden_dim, output_dim, num_layers = 8, 32, 16, 2

    key = jax.random.PRNGKey(0)
    key, kx = jax.random.split(key)
    x = jax.random.normal(kx, (T, B, input_dim), jnp.float32)

    params = init_params(key, input_dim, hidden_dim, output_dim, num_layers)

    y = lstm_forward_pallas(x, params)
    y = jax.block_until_ready(y)

    y_ref = lstm_forward_ref(x, params)
    assert y.shape == (T, B, output_dim), y.shape
    np.testing.assert_allclose(np.asarray(y), np.asarray(y_ref), rtol=1e-4, atol=1e-4)

    print("KERNEL_OK")
</pallas_src>

<mosaic_0001>
module attributes {stable_mosaic.version = 11 : i64} {
  func.func @kernel(%arg0: memref<64x8xf32, #tpu.memory_space<vmem>>, %arg1: memref<160x128xf32, #tpu.memory_space<vmem>>, %arg2: memref<64x128xf32, #tpu.memory_space<vmem>>, %arg3: memref<8x8x128xf32, #tpu.memory_space<vmem>>) attributes {dimension_semantics = [], scalar_prefetch = 0 : i64, scratch_operands = 1 : i64, tpu.core_type = #tpu.core_type<tc>} {
    %c0 = arith.constant 0 : index
    %c0_0 = arith.constant 0 : index
    %0 = vector.load %arg1[%c0, %c0_0] : memref<160x128xf32, #tpu.memory_space<vmem>>, vector<8x128xf32>
    %c40 = arith.constant 40 : index
    %c0_1 = arith.constant 0 : index
    %1 = vector.load %arg1[%c40, %c0_1] : memref<160x128xf32, #tpu.memory_space<vmem>>, vector<1x128xf32>
    %c0_2 = arith.constant 0 : index
    %c0_3 = arith.constant 0 : index
    %2 = vector.load %arg0[%c0_2, %c0_3] : memref<64x8xf32, #tpu.memory_space<vmem>>, vector<64x8xf32>
    %cst = arith.constant dense<0.000000e+00> : vector<64x128xf32>
    %3 = tpu.matmul %2, %0, %cst {dimension_numbers = #tpu.dot_dimension_numbers<[1], [0], [0], [1], [0, 0, 1, 1], [], []>} : vector<64x8xf32>, vector<8x128xf32>, vector<64x128xf32> -> vector<64x128xf32>
    %4 = vector.broadcast %1 : vector<1x128xf32> to vector<64x128xf32>
    %5 = arith.addf %3, %4 : vector<64x128xf32>
    %6 = vector.shape_cast %5 : vector<64x128xf32> to vector<8x8x128xf32>
    %c0_4 = arith.constant 0 : index
    %c0_5 = arith.constant 0 : index
    %c0_6 = arith.constant 0 : index
    %7 = vector.load %arg3[%c0_4, %c0_5, %c0_6] : memref<8x8x128xf32, #tpu.memory_space<vmem>>, vector<8x8x128xf32>
    tpu.vector_store %arg3[%c0_4, %c0_5, %c0_6], %6 {strides = array<i32>} : memref<8x8x128xf32, #tpu.memory_space<vmem>>, vector<8x8x128xf32>,
    %c8 = arith.constant 8 : index
    %c0_7 = arith.constant 0 : index
    %8 = vector.load %arg1[%c8, %c0_7] : memref<160x128xf32, #tpu.memory_space<vmem>>, vector<32x128xf32>
    %cst_8 = arith.constant 0.000000e+00 : f32
    %9 = vector.broadcast %cst_8 : f32 to vector<8x32xf32>
    %cst_9 = arith.constant 0.000000e+00 : f32
    %10 = vector.broadcast %cst_9 : f32 to vector<8x32xf32>
    %c0_10 = arith.constant 0 : index
    %c0_11 = arith.constant 0 : index
    %c0_12 = arith.constant 0 : index
    %11 = vector.load %arg3[%c0_10, %c0_11, %c0_12] : memref<8x8x128xf32, #tpu.memory_space<vmem>>, vector<1x8x128xf32>
    %12 = vector.shape_cast %11 : vector<1x8x128xf32> to vector<8x128xf32>
    %cst_13 = arith.constant dense<0.000000e+00> : vector<8x128xf32>
    %13 = tpu.matmul %9, %8, %cst_13 {dimension_numbers = #tpu.dot_dimension_numbers<[1], [0], [0], [1], [0, 0, 1, 1], [], []>} : vector<8x32xf32>, vector<32x128xf32>, vector<8x128xf32> -> vector<8x128xf32>
    %14 = arith.addf %12, %13 : vector<8x128xf32>
    %15 = arith.negf %14 : vector<8x128xf32>
    %16 = math.exp %15 : vector<8x128xf32>
    %cst_14 = arith.constant 1.000000e+00 : f32
    %17 = vector.broadcast %cst_14 : f32 to vector<8x128xf32>
    %18 = arith.addf %17, %16 : vector<8x128xf32>
    %19 = arith.divf %17, %18 : vector<8x128xf32>
    %20 = vector.extract_strided_slice %19 {offsets = [0, 0], sizes = [8, 32], strides = [1, 1]} : vector<8x128xf32> to vector<8x32xf32>
    %21 = vector.extract_strided_slice %19 {offsets = [0, 32], sizes = [8, 32], strides = [1, 1]} : vector<8x128xf32> to vector<8x32xf32>
    %22 = vector.extract_strided_slice %19 {offsets = [0, 96], sizes = [8, 32], strides = [1, 1]} : vector<8x128xf32> to vector<8x32xf32>
    %23 = vector.extract_strided_slice %14 {offsets = [0, 64], sizes = [8, 32], strides = [1, 1]} : vector<8x128xf32> to vector<8x32xf32>
    %24 = math.tanh %23 : vector<8x32xf32>
    %25 = arith.mulf %21, %10 : vector<8x32xf32>
    %26 = arith.mulf %20, %24 : vector<8x32xf32>
    %27 = arith.addf %25, %26 : vector<8x32xf32>
    %28 = math.tanh %27 : vector<8x32xf32>
    %29 = arith.mulf %22, %28 : vector<8x32xf32>
    %c1 = arith.constant 1 : index
    %c0_15 = arith.constant 0 : index
    %c0_16 = arith.constant 0 : index
    %30 = vector.load %arg3[%c1, %c0_15, %c0_16] : memref<8x8x128xf32, #tpu.memory_space<vmem>>, vector<1x8x128xf32>
    %31 = vector.shape_cast %30 : vector<1x8x128xf32> to vector<8x128xf32>
    %cst_17 = arith.constant dense<0.000000e+00> : vector<8x128xf32>
    %32 = tpu.matmul %29, %8, %cst_17 {dimension_numbers = #tpu.dot_dimension_numbers<[1], [0], [0], [1], [0, 0, 1, 1], [], []>} : vector<8x32xf32>, vector<32x128xf32>, vector<8x128xf32> -> vector<8x128xf32>
    %33 = arith.addf %31, %32 : vector<8x128xf32>
    %34 = arith.negf %33 : vector<8x128xf32>
    %35 = math.exp %34 : vector<8x128xf32>
    %cst_18 = arith.constant 1.000000e+00 : f32
    %36 = vector.broadcast %cst_18 : f32 to vector<8x128xf32>
    %37 = arith.addf %36, %35 : vector<8x128xf32>
    %38 = arith.divf %36, %37 : vector<8x128xf32>
    %39 = vector.extract_strided_slice %38 {offsets = [0, 0], sizes = [8, 32], strides = [1, 1]} : vector<8x128xf32> to vector<8x32xf32>
    %40 = vector.extract_strided_slice %38 {offsets = [0, 32], sizes = [8, 32], strides = [1, 1]} : vector<8x128xf32> to vector<8x32xf32>
    %41 = vector.extract_strided_slice %38 {offsets = [0, 96], sizes = [8, 32], strides = [1, 1]} : vector<8x128xf32> to vector<8x32xf32>
    %42 = vector.extract_strided_slice %33 {offsets = [0, 64], sizes = [8, 32], strides = [1, 1]} : vector<8x128xf32> to vector<8x32xf32>
    %43 = math.tanh %42 : vector<8x32xf32>
    %44 = arith.mulf %40, %27 : vector<8x32xf32>
    %45 = arith.mulf %39, %43 : vector<8x32xf32>
    %46 = arith.addf %44, %45 : vector<8x32xf32>
    %47 = math.tanh %46 : vector<8x32xf32>
    %48 = arith.mulf %41, %47 : vector<8x32xf32>
    %c2 = arith.constant 2 : index
    %c0_19 = arith.constant 0 : index
    %c0_20 = arith.constant 0 : index
    %49 = vector.load %arg3[%c2, %c0_19, %c0_20] : memref<8x8x128xf32, #tpu.memory_space<vmem>>, vector<1x8x128xf32>
    %50 = vector.shape_cast %49 : vector<1x8x128xf32> to vector<8x128xf32>
    %cst_21 = arith.constant dense<0.000000e+00> : vector<8x128xf32>
    %51 = tpu.matmul %48, %8, %cst_21 {dimension_numbers = #tpu.dot_dimension_numbers<[1], [0], [0], [1], [0, 0, 1, 1], [], []>} : vector<8x32xf32>, vector<32x128xf32>, vector<8x128xf32> -> vector<8x128xf32>
    %52 = arith.addf %50, %51 : vector<8x128xf32>
    %53 = arith.negf %52 : vector<8x128xf32>
    %54 = math.exp %53 : vector<8x128xf32>
    %cst_22 = arith.constant 1.000000e+00 : f32
    %55 = vector.broadcast %cst_22 : f32 to vector<8x128xf32>
    %56 = arith.addf %55, %54 : vector<8x128xf32>
    %57 = arith.divf %55, %56 : vector<8x128xf32>
    %58 = vector.extract_strided_slice %57 {offsets = [0, 0], sizes = [8, 32], strides = [1, 1]} : vector<8x128xf32> to vector<8x32xf32>
    %59 = vector.extract_strided_slice %57 {offsets = [0, 32], sizes = [8, 32], strides = [1, 1]} : vector<8x128xf32> to vector<8x32xf32>
    %60 = vector.extract_strided_slice %57 {offsets = [0, 96], sizes = [8, 32], strides = [1, 1]} : vector<8x128xf32> to vector<8x32xf32>
    %61 = vector.extract_strided_slice %52 {offsets = [0, 64], sizes = [8, 32], strides = [1, 1]} : vector<8x128xf32> to vector<8x32xf32>
    %62 = math.tanh %61 : vector<8x32xf32>
    %63 = arith.mulf %59, %46 : vector<8x32xf32>
    %64 = arith.mulf %58, %62 : vector<8x32xf32>
    %65 = arith.addf %63, %64 : vector<8x32xf32>
    %66 = math.tanh %65 : vector<8x32xf32>
    %67 = arith.mulf %60, %66 : vector<8x32xf32>
    %c3 = arith.constant 3 : index
    %c0_23 = arith.constant 0 : index
    %c0_24 = arith.constant 0 : index
    %68 = vector.load %arg3[%c3, %c0_23, %c0_24] : memref<8x8x128xf32, #tpu.memory_space<vmem>>, vector<1x8x128xf32>
    %69 = vector.shape_cast %68 : vector<1x8x128xf32> to vector<8x128xf32>
    %cst_25 = arith.constant dense<0.000000e+00> : vector<8x128xf32>
    %70 = tpu.matmul %67, %8, %cst_25 {dimension_numbers = #tpu.dot_dimension_numbers<[1], [0], [0], [1], [0, 0, 1, 1], [], []>} : vector<8x32xf32>, vector<32x128xf32>, vector<8x128xf32> -> vector<8x128xf32>
    %71 = arith.addf %69, %70 : vector<8x128xf32>
    %72 = arith.negf %71 : vector<8x128xf32>
    %73 = math.exp %72 : vector<8x128xf32>
    %cst_26 = arith.constant 1.000000e+00 : f32
    %74 = vector.broadcast %cst_26 : f32 to vector<8x128xf32>
    %75 = arith.addf %74, %73 : vector<8x128xf32>
    %76 = arith.divf %74, %75 : vector<8x128xf32>
    %77 = vector.extract_strided_slice %76 {offsets = [0, 0], sizes = [8, 32], strides = [1, 1]} : vector<8x128xf32> to vector<8x32xf32>
    %78 = vector.extract_strided_slice %76 {offsets = [0, 32], sizes = [8, 32], strides = [1, 1]} : vector<8x128xf32> to vector<8x32xf32>
    %79 = vector.extract_strided_slice %76 {offsets = [0, 96], sizes = [8, 32], strides = [1, 1]} : vector<8x128xf32> to vector<8x32xf32>
    %80 = vector.extract_strided_slice %71 {offsets = [0, 64], sizes = [8, 32], strides = [1, 1]} : vector<8x128xf32> to vector<8x32xf32>
    %81 = math.tanh %80 : vector<8x32xf32>
    %82 = arith.mulf %78, %65 : vector<8x32xf32>
    %83 = arith.mulf %77, %81 : vector<8x32xf32>
    %84 = arith.addf %82, %83 : vector<8x32xf32>
    %85 = math.tanh %84 : vector<8x32xf32>
    %86 = arith.mulf %79, %85 : vector<8x32xf32>
    %c4 = arith.constant 4 : index
    %c0_27 = arith.constant 0 : index
    %c0_28 = arith.constant 0 : index
    %87 = vector.load %arg3[%c4, %c0_27, %c0_28] : memref<8x8x128xf32, #tpu.memory_space<vmem>>, vector<1x8x128xf32>
    %88 = vector.shape_cast %87 : vector<1x8x128xf32> to vector<8x128xf32>
    %cst_29 = arith.constant dense<0.000000e+00> : vector<8x128xf32>
    %89 = tpu.matmul %86, %8, %cst_29 {dimension_numbers = #tpu.dot_dimension_numbers<[1], [0], [0], [1], [0, 0, 1, 1], [], []>} : vector<8x32xf32>, vector<32x128xf32>, vector<8x128xf32> -> vector<8x128xf32>
    %90 = arith.addf %88, %89 : vector<8x128xf32>
    %91 = arith.negf %90 : vector<8x128xf32>
    %92 = math.exp %91 : vector<8x128xf32>
    %cst_30 = arith.constant 1.000000e+00 : f32
    %93 = vector.broadcast %cst_30 : f32 to vector<8x128xf32>
    %94 = arith.addf %93, %92 : vector<8x128xf32>
    %95 = arith.divf %93, %94 : vector<8x128xf32>
    %96 = vector.extract_strided_slice %95 {offsets = [0, 0], sizes = [8, 32], strides = [1, 1]} : vector<8x128xf32> to vector<8x32xf32>
    %97 = vector.extract_strided_slice %95 {offsets = [0, 32], sizes = [8, 32], strides = [1, 1]} : vector<8x128xf32> to vector<8x32xf32>
    %98 = vector.extract_strided_slice %95 {offsets = [0, 96], sizes = [8, 32], strides = [1, 1]} : vector<8x128xf32> to vector<8x32xf32>
    %99 = vector.extract_strided_slice %90 {offsets = [0, 64], sizes = [8, 32], strides = [1, 1]} : vector<8x128xf32> to vector<8x32xf32>
    %100 = math.tanh %99 : vector<8x32xf32>
    %101 = arith.mulf %97, %84 : vector<8x32xf32>
    %102 = arith.mulf %96, %100 : vector<8x32xf32>
    %103 = arith.addf %101, %102 : vector<8x32xf32>
    %104 = math.tanh %103 : vector<8x32xf32>
    %105 = arith.mulf %98, %104 : vector<8x32xf32>
    %c5 = arith.constant 5 : index
    %c0_31 = arith.constant 0 : index
    %c0_32 = arith.constant 0 : index
    %106 = vector.load %arg3[%c5, %c0_31, %c0_32] : memref<8x8x128xf32, #tpu.memory_space<vmem>>, vector<1x8x128xf32>
    %107 = vector.shape_cast %106 : vector<1x8x128xf32> to vector<8x128xf32>
    %cst_33 = arith.constant dense<0.000000e+00> : vector<8x128xf32>
    %108 = tpu.matmul %105, %8, %cst_33 {dimension_numbers = #tpu.dot_dimension_numbers<[1], [0], [0], [1], [0, 0, 1, 1], [], []>} : vector<8x32xf32>, vector<32x128xf32>, vector<8x128xf32> -> vector<8x128xf32>
    %109 = arith.addf %107, %108 : vector<8x128xf32>
    %110 = arith.negf %109 : vector<8x128xf32>
    %111 = math.exp %110 : vector<8x128xf32>
    %cst_34 = arith.constant 1.000000e+00 : f32
    %112 = vector.broadcast %cst_34 : f32 to vector<8x128xf32>
    %113 = arith.addf %112, %111 : vector<8x128xf32>
    %114 = arith.divf %112, %113 : vector<8x128xf32>
    %115 = vector.extract_strided_slice %114 {offsets = [0, 0], sizes = [8, 32], strides = [1, 1]} : vector<8x128xf32> to vector<8x32xf32>
    %116 = vector.extract_strided_slice %114 {offsets = [0, 32], sizes = [8, 32], strides = [1, 1]} : vector<8x128xf32> to vector<8x32xf32>
    %117 = vector.extract_strided_slice %114 {offsets = [0, 96], sizes = [8, 32], strides = [1, 1]} : vector<8x128xf32> to vector<8x32xf32>
    %118 = vector.extract_strided_slice %109 {offsets = [0, 64], sizes = [8, 32], strides = [1, 1]} : vector<8x128xf32> to vector<8x32xf32>
    %119 = math.tanh %118 : vector<8x32xf32>
    %120 = arith.mulf %116, %103 : vector<8x32xf32>
    %121 = arith.mulf %115, %119 : vector<8x32xf32>
    %122 = arith.addf %120, %121 : vector<8x32xf32>
    %123 = math.tanh %122 : vector<8x32xf32>
    %124 = arith.mulf %117, %123 : vector<8x32xf32>
    %c6 = arith.constant 6 : index
    %c0_35 = arith.constant 0 : index
    %c0_36 = arith.constant 0 : index
    %125 = vector.load %arg3[%c6, %c0_35, %c0_36] : memref<8x8x128xf32, #tpu.memory_space<vmem>>, vector<1x8x128xf32>
    %126 = vector.shape_cast %125 : vector<1x8x128xf32> to vector<8x128xf32>
    %cst_37 = arith.constant dense<0.000000e+00> : vector<8x128xf32>
    %127 = tpu.matmul %124, %8, %cst_37 {dimension_numbers = #tpu.dot_dimension_numbers<[1], [0], [0], [1], [0, 0, 1, 1], [], []>} : vector<8x32xf32>, vector<32x128xf32>, vector<8x128xf32> -> vector<8x128xf32>
    %128 = arith.addf %126, %127 : vector<8x128xf32>
    %129 = arith.negf %128 : vector<8x128xf32>
    %130 = math.exp %129 : vector<8x128xf32>
    %cst_38 = arith.constant 1.000000e+00 : f32
    %131 = vector.broadcast %cst_38 : f32 to vector<8x128xf32>
    %132 = arith.addf %131, %130 : vector<8x128xf32>
    %133 = arith.divf %131, %132 : vector<8x128xf32>
    %134 = vector.extract_strided_slice %133 {offsets = [0, 0], sizes = [8, 32], strides = [1, 1]} : vector<8x128xf32> to vector<8x32xf32>
    %135 = vector.extract_strided_slice %133 {offsets = [0, 32], sizes = [8, 32], strides = [1, 1]} : vector<8x128xf32> to vector<8x32xf32>
    %136 = vector.extract_strided_slice %133 {offsets = [0, 96], sizes = [8, 32], strides = [1, 1]} : vector<8x128xf32> to vector<8x32xf32>
    %137 = vector.extract_strided_slice %128 {offsets = [0, 64], sizes = [8, 32], strides = [1, 1]} : vector<8x128xf32> to vector<8x32xf32>
    %138 = math.tanh %137 : vector<8x32xf32>
    %139 = arith.mulf %135, %122 : vector<8x32xf32>
    %140 = arith.mulf %134, %138 : vector<8x32xf32>
    %141 = arith.addf %139, %140 : vector<8x32xf32>
    %142 = math.tanh %141 : vector<8x32xf32>
    %143 = arith.mulf %136, %142 : vector<8x32xf32>
    %c7 = arith.constant 7 : index
    %c0_39 = arith.constant 0 : index
    %c0_40 = arith.constant 0 : index
    %144 = vector.load %arg3[%c7, %c0_39, %c0_40] : memref<8x8x128xf32, #tpu.memory_space<vmem>>, vector<1x8x128xf32>
    %145 = vector.shape_cast %144 : vector<1x8x128xf32> to vector<8x128xf32>
    %cst_41 = arith.constant dense<0.000000e+00> : vector<8x128xf32>
    %146 = tpu.matmul %143, %8, %cst_41 {dimension_numbers = #tpu.dot_dimension_numbers<[1], [0], [0], [1], [0, 0, 1, 1], [], []>} : vector<8x32xf32>, vector<32x128xf32>, vector<8x128xf32> -> vector<8x128xf32>
    %147 = arith.addf %145, %146 : vector<8x128xf32>
    %148 = arith.negf %147 : vector<8x128xf32>
    %149 = math.exp %148 : vector<8x128xf32>
    %cst_42 = arith.constant 1.000000e+00 : f32
    %150 = vector.broadcast %cst_42 : f32 to vector<8x128xf32>
    %151 = arith.addf %150, %149 : vector<8x128xf32>
    %152 = arith.divf %150, %151 : vector<8x128xf32>
    %153 = vector.extract_strided_slice %152 {offsets = [0, 0], sizes = [8, 32], strides = [1, 1]} : vector<8x128xf32> to vector<8x32xf32>
    %154 = vector.extract_strided_slice %152 {offsets = [0, 32], sizes = [8, 32], strides = [1, 1]} : vector<8x128xf32> to vector<8x32xf32>
    %155 = vector.extract_strided_slice %152 {offsets = [0, 96], sizes = [8, 32], strides = [1, 1]} : vector<8x128xf32> to vector<8x32xf32>
    %156 = vector.extract_strided_slice %147 {offsets = [0, 64], sizes = [8, 32], strides = [1, 1]} : vector<8x128xf32> to vector<8x32xf32>
    %157 = math.tanh %156 : vector<8x32xf32>
    %158 = arith.mulf %154, %141 : vector<8x32xf32>
    %159 = arith.mulf %153, %157 : vector<8x32xf32>
    %160 = arith.addf %158, %159 : vector<8x32xf32>
    %161 = math.tanh %160 : vector<8x32xf32>
    %162 = arith.mulf %155, %161 : vector<8x32xf32>
    %c48 = arith.constant 48 : index
    %c0_43 = arith.constant 0 : index
    %163 = vector.load %arg1[%c48, %c0_43] : memref<160x128xf32, #tpu.memory_space<vmem>>, vector<32x128xf32>
    %c80 = arith.constant 80 : index
    %c0_44 = arith.constant 0 : index
    %164 = vector.load %arg1[%c80, %c0_44] : memref<160x128xf32, #tpu.memory_space<vmem>>, vector<32x128xf32>
    %c112 = arith.constant 112 : index
    %c0_45 = arith.constant 0 : index
    %165 = vector.load %arg1[%c112, %c0_45] : memref<160x128xf32, #tpu.memory_space<vmem>>, vector<1x128xf32>
    %cst_46 = arith.constant 0.000000e+00 : f32
    %166 = vector.broadcast %cst_46 : f32 to vector<8x32xf32>
    %cst_47 = arith.constant 0.000000e+00 : f32
    %167 = vector.broadcast %cst_47 : f32 to vector<8x32xf32>
    %cst_48 = arith.constant dense<0.000000e+00> : vector<8x128xf32>
    %168 = tpu.matmul %29, %163, %cst_48 {dimension_numbers = #tpu.dot_dimension_numbers<[1], [0], [0], [1], [0, 0, 1, 1], [], []>} : vector<8x32xf32>, vector<32x128xf32>, vector<8x128xf32> -> vector<8x128xf32>
    %cst_49 = arith.constant dense<0.000000e+00> : vector<8x128xf32>
    %169 = tpu.matmul %166, %164, %cst_49 {dimension_numbers = #tpu.dot_dimension_numbers<[1], [0], [0], [1], [0, 0, 1, 1], [], []>} : vector<8x32xf32>, vector<32x128xf32>, vector<8x128xf32> -> vector<8x128xf32>
    %170 = arith.addf %168, %169 : vector<8x128xf32>
    %171 = vector.broadcast %165 : vector<1x128xf32> to vector<8x128xf32>
    %172 = arith.addf %170, %171 : vector<8x128xf32>
    %173 = arith.negf %172 : vector<8x128xf32>
    %174 = math.exp %173 : vector<8x128xf32>
    %cst_50 = arith.constant 1.000000e+00 : f32
    %175 = vector.broadcast %cst_50 : f32 to vector<8x128xf32>
    %176 = arith.addf %175, %174 : vector<8x128xf32>
    %177 = arith.divf %175, %176 : vector<8x128xf32>
    %178 = vector.extract_strided_slice %177 {offsets = [0, 0], sizes = [8, 32], strides = [1, 1]} : vector<8x128xf32> to vector<8x32xf32>
    %179 = vector.extract_strided_slice %177 {offsets = [0, 32], sizes = [8, 32], strides = [1, 1]} : vector<8x128xf32> to vector<8x32xf32>
    %180 = vector.extract_strided_slice %177 {offsets = [0, 96], sizes = [8, 32], strides = [1, 1]} : vector<8x128xf32> to vector<8x32xf32>
    %181 = vector.extract_strided_slice %172 {offsets = [0, 64], sizes = [8, 32], strides = [1, 1]} : vector<8x128xf32> to vector<8x32xf32>
    %182 = math.tanh %181 : vector<8x32xf32>
    %183 = arith.mulf %179, %167 : vector<8x32xf32>
    %184 = arith.mulf %178, %182 : vector<8x32xf32>
    %185 = arith.addf %183, %184 : vector<8x32xf32>
    %186 = math.tanh %185 : vector<8x32xf32>
    %187 = arith.mulf %180, %186 : vector<8x32xf32>
    %cst_51 = arith.constant dense<0.000000e+00> : vector<8x128xf32>
    %188 = tpu.matmul %48, %163, %cst_51 {dimension_numbers = #tpu.dot_dimension_numbers<[1], [0], [0], [1], [0, 0, 1, 1], [], []>} : vector<8x32xf32>, vector<32x128xf32>, vector<8x128xf32> -> vector<8x128xf32>
    %cst_52 = arith.constant dense<0.000000e+00> : vector<8x128xf32>
    %189 = tpu.matmul %187, %164, %cst_52 {dimension_numbers = #tpu.dot_dimension_numbers<[1], [0], [0], [1], [0, 0, 1, 1], [], []>} : vector<8x32xf32>, vector<32x128xf32>, vector<8x128xf32> -> vector<8x128xf32>
    %190 = arith.addf %188, %189 : vector<8x128xf32>
    %191 = vector.broadcast %165 : vector<1x128xf32> to vector<8x128xf32>
    %192 = arith.addf %190, %191 : vector<8x128xf32>
    %193 = arith.negf %192 : vector<8x128xf32>
    %194 = math.exp %193 : vector<8x128xf32>
    %cst_53 = arith.constant 1.000000e+00 : f32
    %195 = vector.broadcast %cst_53 : f32 to vector<8x128xf32>
    %196 = arith.addf %195, %194 : vector<8x128xf32>
    %197 = arith.divf %195, %196 : vector<8x128xf32>
    %198 = vector.extract_strided_slice %197 {offsets = [0, 0], sizes = [8, 32], strides = [1, 1]} : vector<8x128xf32> to vector<8x32xf32>
    %199 = vector.extract_strided_slice %197 {offsets = [0, 32], sizes = [8, 32], strides = [1, 1]} : vector<8x128xf32> to vector<8x32xf32>
    %200 = vector.extract_strided_slice %197 {offsets = [0, 96], sizes = [8, 32], strides = [1, 1]} : vector<8x128xf32> to vector<8x32xf32>
    %201 = vector.extract_strided_slice %192 {offsets = [0, 64], sizes = [8, 32], strides = [1, 1]} : vector<8x128xf32> to vector<8x32xf32>
    %202 = math.tanh %201 : vector<8x32xf32>
    %203 = arith.mulf %199, %185 : vector<8x32xf32>
    %204 = arith.mulf %198, %202 : vector<8x32xf32>
    %205 = arith.addf %203, %204 : vector<8x32xf32>
    %206 = math.tanh %205 : vector<8x32xf32>
    %207 = arith.mulf %200, %206 : vector<8x32xf32>
    %cst_54 = arith.constant dense<0.000000e+00> : vector<8x128xf32>
    %208 = tpu.matmul %67, %163, %cst_54 {dimension_numbers = #tpu.dot_dimension_numbers<[1], [0], [0], [1], [0, 0, 1, 1], [], []>} : vector<8x32xf32>, vector<32x128xf32>, vector<8x128xf32> -> vector<8x128xf32>
    %cst_55 = arith.constant dense<0.000000e+00> : vector<8x128xf32>
    %209 = tpu.matmul %207, %164, %cst_55 {dimension_numbers = #tpu.dot_dimension_numbers<[1], [0], [0], [1], [0, 0, 1, 1], [], []>} : vector<8x32xf32>, vector<32x128xf32>, vector<8x128xf32> -> vector<8x128xf32>
    %210 = arith.addf %208, %209 : vector<8x128xf32>
    %211 = vector.broadcast %165 : vector<1x128xf32> to vector<8x128xf32>
    %212 = arith.addf %210, %211 : vector<8x128xf32>
    %213 = arith.negf %212 : vector<8x128xf32>
    %214 = math.exp %213 : vector<8x128xf32>
    %cst_56 = arith.constant 1.000000e+00 : f32
    %215 = vector.broadcast %cst_56 : f32 to vector<8x128xf32>
    %216 = arith.addf %215, %214 : vector<8x128xf32>
    %217 = arith.divf %215, %216 : vector<8x128xf32>
    %218 = vector.extract_strided_slice %217 {offsets = [0, 0], sizes = [8, 32], strides = [1, 1]} : vector<8x128xf32> to vector<8x32xf32>
    %219 = vector.extract_strided_slice %217 {offsets = [0, 32], sizes = [8, 32], strides = [1, 1]} : vector<8x128xf32> to vector<8x32xf32>
    %220 = vector.extract_strided_slice %217 {offsets = [0, 96], sizes = [8, 32], strides = [1, 1]} : vector<8x128xf32> to vector<8x32xf32>
    %221 = vector.extract_strided_slice %212 {offsets = [0, 64], sizes = [8, 32], strides = [1, 1]} : vector<8x128xf32> to vector<8x32xf32>
    %222 = math.tanh %221 : vector<8x32xf32>
    %223 = arith.mulf %219, %205 : vector<8x32xf32>
    %224 = arith.mulf %218, %222 : vector<8x32xf32>
    %225 = arith.addf %223, %224 : vector<8x32xf32>
    %226 = math.tanh %225 : vector<8x32xf32>
    %227 = arith.mulf %220, %226 : vector<8x32xf32>
    %cst_57 = arith.constant dense<0.000000e+00> : vector<8x128xf32>
    %228 = tpu.matmul %86, %163, %cst_57 {dimension_numbers = #tpu.dot_dimension_numbers<[1], [0], [0], [1], [0, 0, 1, 1], [], []>} : vector<8x32xf32>, vector<32x128xf32>, vector<8x128xf32> -> vector<8x128xf32>
    %cst_58 = arith.constant dense<0.000000e+00> : vector<8x128xf32>
    %229 = tpu.matmul %227, %164, %cst_58 {dimension_numbers = #tpu.dot_dimension_numbers<[1], [0], [0], [1], [0, 0, 1, 1], [], []>} : vector<8x32xf32>, vector<32x128xf32>, vector<8x128xf32> -> vector<8x128xf32>
    %230 = arith.addf %228, %229 : vector<8x128xf32>
    %231 = vector.broadcast %165 : vector<1x128xf32> to vector<8x128xf32>
    %232 = arith.addf %230, %231 : vector<8x128xf32>
    %233 = arith.negf %232 : vector<8x128xf32>
    %234 = math.exp %233 : vector<8x128xf32>
    %cst_59 = arith.constant 1.000000e+00 : f32
    %235 = vector.broadcast %cst_59 : f32 to vector<8x128xf32>
    %236 = arith.addf %235, %234 : vector<8x128xf32>
    %237 = arith.divf %235, %236 : vector<8x128xf32>
    %238 = vector.extract_strided_slice %237 {offsets = [0, 0], sizes = [8, 32], strides = [1, 1]} : vector<8x128xf32> to vector<8x32xf32>
    %239 = vector.extract_strided_slice %237 {offsets = [0, 32], sizes = [8, 32], strides = [1, 1]} : vector<8x128xf32> to vector<8x32xf32>
    %240 = vector.extract_strided_slice %237 {offsets = [0, 96], sizes = [8, 32], strides = [1, 1]} : vector<8x128xf32> to vector<8x32xf32>
    %241 = vector.extract_strided_slice %232 {offsets = [0, 64], sizes = [8, 32], strides = [1, 1]} : vector<8x128xf32> to vector<8x32xf32>
    %242 = math.tanh %241 : vector<8x32xf32>
    %243 = arith.mulf %239, %225 : vector<8x32xf32>
    %244 = arith.mulf %238, %242 : vector<8x32xf32>
    %245 = arith.addf %243, %244 : vector<8x32xf32>
    %246 = math.tanh %245 : vector<8x32xf32>
    %247 = arith.mulf %240, %246 : vector<8x32xf32>
    %cst_60 = arith.constant dense<0.000000e+00> : vector<8x128xf32>
    %248 = tpu.matmul %105, %163, %cst_60 {dimension_numbers = #tpu.dot_dimension_numbers<[1], [0], [0], [1], [0, 0, 1, 1], [], []>} : vector<8x32xf32>, vector<32x128xf32>, vector<8x128xf32> -> vector<8x128xf32>
    %cst_61 = arith.constant dense<0.000000e+00> : vector<8x128xf32>
    %249 = tpu.matmul %247, %164, %cst_61 {dimension_numbers = #tpu.dot_dimension_numbers<[1], [0], [0], [1], [0, 0, 1, 1], [], []>} : vector<8x32xf32>, vector<32x128xf32>, vector<8x128xf32> -> vector<8x128xf32>
    %250 = arith.addf %248, %249 : vector<8x128xf32>
    %251 = vector.broadcast %165 : vector<1x128xf32> to vector<8x128xf32>
    %252 = arith.addf %250, %251 : vector<8x128xf32>
    %253 = arith.negf %252 : vector<8x128xf32>
    %254 = math.exp %253 : vector<8x128xf32>
    %cst_62 = arith.constant 1.000000e+00 : f32
    %255 = vector.broadcast %cst_62 : f32 to vector<8x128xf32>
    %256 = arith.addf %255, %254 : vector<8x128xf32>
    %257 = arith.divf %255, %256 : vector<8x128xf32>
    %258 = vector.extract_strided_slice %257 {offsets = [0, 0], sizes = [8, 32], strides = [1, 1]} : vector<8x128xf32> to vector<8x32xf32>
    %259 = vector.extract_strided_slice %257 {offsets = [0, 32], sizes = [8, 32], strides = [1, 1]} : vector<8x128xf32> to vector<8x32xf32>
    %260 = vector.extract_strided_slice %257 {offsets = [0, 96], sizes = [8, 32], strides = [1, 1]} : vector<8x128xf32> to vector<8x32xf32>
    %261 = vector.extract_strided_slice %252 {offsets = [0, 64], sizes = [8, 32], strides = [1, 1]} : vector<8x128xf32> to vector<8x32xf32>
    %262 = math.tanh %261 : vector<8x32xf32>
    %263 = arith.mulf %259, %245 : vector<8x32xf32>
    %264 = arith.mulf %258, %262 : vector<8x32xf32>
    %265 = arith.addf %263, %264 : vector<8x32xf32>
    %266 = math.tanh %265 : vector<8x32xf32>
    %267 = arith.mulf %260, %266 : vector<8x32xf32>
    %cst_63 = arith.constant dense<0.000000e+00> : vector<8x128xf32>
    %268 = tpu.matmul %124, %163, %cst_63 {dimension_numbers = #tpu.dot_dimension_numbers<[1], [0], [0], [1], [0, 0, 1, 1], [], []>} : vector<8x32xf32>, vector<32x128xf32>, vector<8x128xf32> -> vector<8x128xf32>
    %cst_64 = arith.constant dense<0.000000e+00> : vector<8x128xf32>
    %269 = tpu.matmul %267, %164, %cst_64 {dimension_numbers = #tpu.dot_dimension_numbers<[1], [0], [0], [1], [0, 0, 1, 1], [], []>} : vector<8x32xf32>, vector<32x128xf32>, vector<8x128xf32> -> vector<8x128xf32>
    %270 = arith.addf %268, %269 : vector<8x128xf32>
    %271 = vector.broadcast %165 : vector<1x128xf32> to vector<8x128xf32>
    %272 = arith.addf %270, %271 : vector<8x128xf32>
    %273 = arith.negf %272 : vector<8x128xf32>
    %274 = math.exp %273 : vector<8x128xf32>
    %cst_65 = arith.constant 1.000000e+00 : f32
    %275 = vector.broadcast %cst_65 : f32 to vector<8x128xf32>
    %276 = arith.addf %275, %274 : vector<8x128xf32>
    %277 = arith.divf %275, %276 : vector<8x128xf32>
    %278 = vector.extract_strided_slice %277 {offsets = [0, 0], sizes = [8, 32], strides = [1, 1]} : vector<8x128xf32> to vector<8x32xf32>
    %279 = vector.extract_strided_slice %277 {offsets = [0, 32], sizes = [8, 32], strides = [1, 1]} : vector<8x128xf32> to vector<8x32xf32>
    %280 = vector.extract_strided_slice %277 {offsets = [0, 96], sizes = [8, 32], strides = [1, 1]} : vector<8x128xf32> to vector<8x32xf32>
    %281 = vector.extract_strided_slice %272 {offsets = [0, 64], sizes = [8, 32], strides = [1, 1]} : vector<8x128xf32> to vector<8x32xf32>
    %282 = math.tanh %281 : vector<8x32xf32>
    %283 = arith.mulf %279, %265 : vector<8x32xf32>
    %284 = arith.mulf %278, %282 : vector<8x32xf32>
    %285 = arith.addf %283, %284 : vector<8x32xf32>
    %286 = math.tanh %285 : vector<8x32xf32>
    %287 = arith.mulf %280, %286 : vector<8x32xf32>
    %cst_66 = arith.constant dense<0.000000e+00> : vector<8x128xf32>
    %288 = tpu.matmul %143, %163, %cst_66 {dimension_numbers = #tpu.dot_dimension_numbers<[1], [0], [0], [1], [0, 0, 1, 1], [], []>} : vector<8x32xf32>, vector<32x128xf32>, vector<8x128xf32> -> vector<8x128xf32>
    %cst_67 = arith.constant dense<0.000000e+00> : vector<8x128xf32>
    %289 = tpu.matmul %287, %164, %cst_67 {dimension_numbers = #tpu.dot_dimension_numbers<[1], [0], [0], [1], [0, 0, 1, 1], [], []>} : vector<8x32xf32>, vector<32x128xf32>, vector<8x128xf32> -> vector<8x128xf32>
    %290 = arith.addf %288, %289 : vector<8x128xf32>
    %291 = vector.broadcast %165 : vector<1x128xf32> to vector<8x128xf32>
    %292 = arith.addf %290, %291 : vector<8x128xf32>
    %293 = arith.negf %292 : vector<8x128xf32>
    %294 = math.exp %293 : vector<8x128xf32>
    %cst_68 = arith.constant 1.000000e+00 : f32
    %295 = vector.broadcast %cst_68 : f32 to vector<8x128xf32>
    %296 = arith.addf %295, %294 : vector<8x128xf32>
    %297 = arith.divf %295, %296 : vector<8x128xf32>
    %298 = vector.extract_strided_slice %297 {offsets = [0, 0], sizes = [8, 32], strides = [1, 1]} : vector<8x128xf32> to vector<8x32xf32>
    %299 = vector.extract_strided_slice %297 {offsets = [0, 32], sizes = [8, 32], strides = [1, 1]} : vector<8x128xf32> to vector<8x32xf32>
    %300 = vector.extract_strided_slice %297 {offsets = [0, 96], sizes = [8, 32], strides = [1, 1]} : vector<8x128xf32> to vector<8x32xf32>
    %301 = vector.extract_strided_slice %292 {offsets = [0, 64], sizes = [8, 32], strides = [1, 1]} : vector<8x128xf32> to vector<8x32xf32>
    %302 = math.tanh %301 : vector<8x32xf32>
    %303 = arith.mulf %299, %285 : vector<8x32xf32>
    %304 = arith.mulf %298, %302 : vector<8x32xf32>
    %305 = arith.addf %303, %304 : vector<8x32xf32>
    %306 = math.tanh %305 : vector<8x32xf32>
    %307 = arith.mulf %300, %306 : vector<8x32xf32>
    %cst_69 = arith.constant dense<0.000000e+00> : vector<8x128xf32>
    %308 = tpu.matmul %162, %163, %cst_69 {dimension_numbers = #tpu.dot_dimension_numbers<[1], [0], [0], [1], [0, 0, 1, 1], [], []>} : vector<8x32xf32>, vector<32x128xf32>, vector<8x128xf32> -> vector<8x128xf32>
    %cst_70 = arith.constant dense<0.000000e+00> : vector<8x128xf32>
    %309 = tpu.matmul %307, %164, %cst_70 {dimension_numbers = #tpu.dot_dimension_numbers<[1], [0], [0], [1], [0, 0, 1, 1], [], []>} : vector<8x32xf32>, vector<32x128xf32>, vector<8x128xf32> -> vector<8x128xf32>
    %310 = arith.addf %308, %309 : vector<8x128xf32>
    %311 = vector.broadcast %165 : vector<1x128xf32> to vector<8x128xf32>
    %312 = arith.addf %310, %311 : vector<8x128xf32>
    %313 = arith.negf %312 : vector<8x128xf32>
    %314 = math.exp %313 : vector<8x128xf32>
    %cst_71 = arith.constant 1.000000e+00 : f32
    %315 = vector.broadcast %cst_71 : f32 to vector<8x128xf32>
    %316 = arith.addf %315, %314 : vector<8x128xf32>
    %317 = arith.divf %315, %316 : vector<8x128xf32>
    %318 = vector.extract_strided_slice %317 {offsets = [0, 0], sizes = [8, 32], strides = [1, 1]} : vector<8x128xf32> to vector<8x32xf32>
    %319 = vector.extract_strided_slice %317 {offsets = [0, 32], sizes = [8, 32], strides = [1, 1]} : vector<8x128xf32> to vector<8x32xf32>
    %320 = vector.extract_strided_slice %317 {offsets = [0, 96], sizes = [8, 32], strides = [1, 1]} : vector<8x128xf32> to vector<8x32xf32>
    %321 = vector.extract_strided_slice %312 {offsets = [0, 64], sizes = [8, 32], strides = [1, 1]} : vector<8x128xf32> to vector<8x32xf32>
    %322 = math.tanh %321 : vector<8x32xf32>
    %323 = arith.mulf %319, %305 : vector<8x32xf32>
    %324 = arith.mulf %318, %322 : vector<8x32xf32>
    %325 = arith.addf %323, %324 : vector<8x32xf32>
    %326 = math.tanh %325 : vector<8x32xf32>
    %327 = arith.mulf %320, %326 : vector<8x32xf32>
    %328 = tpu.concatenate %187, %207, %227, %247, %267, %287, %307, %327 in 0 : vector<8x32xf32>, vector<8x32xf32>, vector<8x32xf32>, vector<8x32xf32>, vector<8x32xf32>, vector<8x32xf32>, vector<8x32xf32>, vector<8x32xf32> -> vector<64x32xf32>
    %c120 = arith.constant 120 : index
    %c0_72 = arith.constant 0 : index
    %329 = vector.load %arg1[%c120, %c0_72] : memref<160x128xf32, #tpu.memory_space<vmem>>, vector<32x128xf32>
    %c152 = arith.constant 152 : index
    %c0_73 = arith.constant 0 : index
    %330 = vector.load %arg1[%c152, %c0_73] : memref<160x128xf32, #tpu.memory_space<vmem>>, vector<1x128xf32>
    %cst_74 = arith.constant dense<0.000000e+00> : vector<64x128xf32>
    %331 = tpu.matmul %328, %329, %cst_74 {dimension_numbers = #tpu.dot_dimension_numbers<[1], [0], [0], [1], [0, 0, 1, 1], [], []>} : vector<64x32xf32>, vector<32x128xf32>, vector<64x128xf32> -> vector<64x128xf32>
    %332 = vector.broadcast %330 : vector<1x128xf32> to vector<64x128xf32>
    %333 = arith.addf %331, %332 : vector<64x128xf32>
    %c0_75 = arith.constant 0 : index
    %c0_76 = arith.constant 0 : index
    %334 = vector.load %arg2[%c0_75, %c0_76] : memref<64x128xf32, #tpu.memory_space<vmem>>, vector<64x128xf32>
    tpu.vector_store %arg2[%c0_75, %c0_76], %333 {strides = array<i32>} : memref<64x128xf32, #tpu.memory_space<vmem>>, vector<64x128xf32>,
    return
  }
}

</mosaic_0001>

<bundles_post_ra>
// kernel: lstm_forward_pallas.1
= control target key start
LH: loop header
LB: loop body
LE: loop exit
PB: predicated region body
PF: predicated region fallthrough
CT: control target
= control target key end

     0   :  { %vm25_vm0 = vcmask 64512   ;;  %v3268_v8 = vmov 0.0|0.0   ;;  %vm3269_vm1 = vmmov 0   ;;  %v3270_v14 = vmov 0.0   ;;  %s3271_s5 = smov 64   ;;  %s3272_s6 = smov 32   ;;  %s3739_s1 = inlined_call_operand.vmem [shape: f32[160,128], index: 1, kind: input, shape index: {}]   ;;  %s3740_s0 = inlined_call_operand.vmem [shape: f32[64,8], index: 0, kind: input, shape index: {}]   ;;  %s3741_s2 = inlined_call_operand.vmem [shape: f32[64,128], index: 2, kind: output, shape index: {}]  }
   0x1   :  { %v11_v0 = vld [vmem:[%s3739_s1] sm:$0xff]  ;;  %v18_v2 = vld [vmem:[%s3740_s0 + $0x28] sm:$0xff]  ;;  %v164_v4 = vld [vmem:[%s3739_s1 + $0x10] sm:$0xff]  ;;  %vm168_vm2 = vcmask 261120  }
   0x2   :  { %v17_v1 = vld [vmem:[%s3740_s0 + $0x20] sm:$0xff]  ;;  %3133 = vmatprep.subr.mxu1 %v11_v0  ;;  %v163_v3 = vld [vmem:[%s3739_s1 + $0x8] sm:$0xff]  ;;  %v19_v5 = vld [vmem:[%s3740_s0 + $0x30] sm:$0xff]  ;;  %2683 = vmatprep.subr.mxu0 %v11_v0 }
   0x3   :  { %2691 = vmatprep.mubr.msk.f32.mxu1 %vm25_vm0, %v17_v1  ;;  %3134 = vmatpush3.msra.mxu1 %v11_v0  ;;  %v3307_v6 = vpack.c.bf16 %v164_v4, %v163_v3  ;;  %v13_v7 = vld [vmem:[%s3740_s0] sm:$0xff]  ;;  %v14_v9 = vld [vmem:[%s3740_s0 + $0x8] sm:$0xff]  ;;  %v165_v10 = vld [vmem:[%s3739_s1 + $0x18] sm:$0xff] }
   0x4   :  { %2692 = vmatmul.mubr.msk.f32.vlgmr.msra.gmra.mrb[0].mxu1 %vm25_vm0, %v18_v2  ;;  %2981 = vmatprep.subr.bf16.mxu1 %v3268_v8  ;;  %v166_v11 = vld [vmem:[%s3739_s1 + $0x20] sm:$0xff]  ;;  %v20_v12 = vld [vmem:[%s3740_s0 + $0x38] sm:$0xff]  ;;  %v3357_v18 = vld [vmem:[%s3739_s1 + $0x28] ss:$0 sm:$0xff] }
   0x5   :  { %2983 = vmatpush3.bf16.msra.mxu1 %v3307_v6  ;;  %2694 = vmatprep.mubr.msk.f32.mxu1 %vm25_vm0, %v19_v5  ;;  %v3328_v13 = vpack.c.bf16 %v166_v11, %v165_v10  ;;  %v15_v54 = vld [vmem:[%s3740_s0 + $0x10] sm:$0xff]  ;;  %v16_v55 = vld [vmem:[%s3740_s0 + $0x18] sm:$0xff] }
   0x6   :  { %2684 = vmatpush3.msra.mxu0 %v11_v0  ;;  %2685 = vmatprep.mubr.msk.f32.mxu0 %vm25_vm0, %v13_v7 }
   0x7   :  { %2984 = vmatprep.subr.bf16.mxu1 %v3268_v8  ;;  %2686 = vmatmul.mubr.msk.f32.vlgmr.msra.gmra.mrb[0].mxu0 %vm25_vm0, %v14_v9 }
   0x8   :  { %2695 = vmatmul.mubr.msk.f32.gmra.mrb[2].mxu1 %vm25_vm0, %v20_v12  ;;  %2993 = vmatprep.subr.bf16.mxu0 %v3268_v8 }
   0x9   :  { %2986 = vmatpush3.bf16.msra.mxu1 %v3328_v13  ;;  %2705 = vmatprep.mubr.msk.f32.mxu1 %vm3269_vm1, %v3270_v14 }
   0xa   :  { %2987 = vmatprep.subr.bf16.mxu1 %v3268_v8  ;;  %2995 = vmatpush3.bf16.msra.mxu0 %v3307_v6 }
   0xb   :  { %2996 = vmatprep.subr.bf16.mxu0 %v3268_v8  ;;  %2688 = vmatprep.mubr.msk.f32.mxu0 %vm25_vm0, %v15_v54 }
   0xc   :  { %2706 = vmatmul.mubr.f32.vlgmr.msra.gmra.mrb[4].mxu1 %v3270_v14  ;;  %2689 = vmatmul.mubr.msk.f32.gmra.mrb[2].mxu0 %vm25_vm0, %v16_v55 }
   0xd   :  { %2989 = vmatpush3.bf16.msra.mxu1 %v3307_v6  ;;  %2716 = vmatprep.mubr.msk.f32.mxu1 %vm3269_vm1, %v3270_v14 }
   0xe   :  { %2990 = vmatprep.subr.bf16.mxu1 %v3268_v8  ;;  %2998 = vmatpush3.bf16.msra.mxu0 %v3328_v13 }
   0xf   :  { %3005 = vmatprep.subr.bf16.mxu0 %v3268_v8  ;;  %2727 = vmatprep.mubr.msk.f32.mxu0 %vm3269_vm1, %v3270_v14 }
  0x11   :  { %2992 = vmatpush3.bf16.msra.mxu1 %v3328_v13 }
  0x12   :  { %2999 = vmatprep.subr.bf16.mxu1 %v3268_v8 }
  0xd7   :  { %v3350_v15 = vpop.f32.mrb[0].mxu1 }
  0xd8   :  { %v3352_v16 = vpop.f32.mrb[1].mxu1 }
  0xda   :  { %v2687_v17 = vpop.f32.mrb[0].mxu0 }
  0xdb   :  { %v3359_v19 = vpop.f32.mrb[2].mxu1  ;;  %v116_v20 = vpop.f32.mrb[1].mxu0  ;;  %v122_v40 = vadd.f32 %v2687_v17, %v3357_v18 }
  0xdc   :  { %v3361_v21 = vpop.f32.mrb[3].mxu1  ;;  %v117_v22 = vadd.f32 %v3357_v18, %v116_v20 }
  0xdf   :  { %v238_v23 = vpop.f32.mrb[4].mxu1  ;;  %v2690_v59 = vpop.f32.mrb[2].mxu0 }
  0xe0   :  { %v242_v24 = vadd.f32 %v238_v23, %v117_v22  ;;  %v2707_v25 = vpop.f32.mrb[5].mxu1  ;;  %v126_v60 = vpop.f32.mrb[3].mxu0 }
  0xe1   :  { %v127_v62 = vadd.f32 %v3357_v18, %v126_v60  ;;  %v132_v25 = vadd.f32 %v2690_v59, %v3357_v18 }
  0xe2   :  { %3140 = vtanh.f32 %v242_v24  ;;  %v2494_v27 = vmul.f32 -1.442695, %v242_v24 }
  0xe4   :  { %3142 = vpow2.f32 %v2494_v27 }
  0xec   :  { %v3141_v26 = vpop.eup %3140 }
  0xed   :  { %252 = vrot.lane.b32.xlu0 %v3141_v26, %s3271_s5 }
  0xee   :  { %v3143_v28 = vpop.eup %3142 }
  0xef   :  { %v246_v29 = vadd.f32 1.0, %v3143_v28 }
  0xf1   :  { %3144 = vrcp.f32 %v246_v29 }
  0xfb   :  { %v3145_v30 = vpop.eup %3144 }
  0xfc   :  { %v250_v33 = vmul.f32 0.0, %v3145_v30 }
 0x15f   :  { %v253_v31 = vpop.permute.xlu0 %252 }
 0x160   :  { %v255_v32 = vmul.f32 %v3145_v30, %v253_v31 }
 0x162   :  { %257 = vrot.lane.b32.xlu0 %v255_v32, %s3272_s6 }
 0x1d4   :  { %v258_v34 = vpop.permute.xlu0 %257 }
 0x1d5   :  { %v260_v35 = vadd.f32 %v258_v34, %v250_v33 }
 0x1d7   :  { %3146 = vtanh.f32 %v260_v35 }
 0x1e1   :  { %v3147_v36 = vpop.eup %3146 }
 0x1e2   :  { %263 = vrot.lane.b32.xlu1 %v3147_v36, %s3271_s5 }
 0x254   :  { %v264_v37 = vpop.permute.xlu1 %263 }
 0x255   :  { %v266_v38 = vmul.f32 %v3145_v30, %v264_v37 }
 0x257   :  { %270 = vrot.lane.b32.xlu1 %v266_v38, %s3272_s6 }
 0x2c9   :  { %v3368_v39 = vpop.permute.xlu1 %270 }
 0x2ca   :  { %2717 = vmatmul.mubr.msk.f32.vlgmr.msra.gmra.mrb[6].mxu1 %vm168_vm2, %v3368_v39 }
 0x2cb   :  { %3001 = vmatpush3.bf16.msra.mxu1 %v3307_v6  ;;  %2738 = vmatprep.mubr.msk.f32.mxu1 %vm3269_vm1, %v3270_v14 }
 0x2cc   :  { %3002 = vmatprep.subr.bf16.mxu1 %v3268_v8 }
 0x2cf   :  { %3004 = vmatpush3.bf16.msra.mxu1 %v3328_v13 }
 0x2d0   :  { %3011 = vmatprep.subr.bf16.mxu1 %v3268_v8 }
 0x39d   :  { %v340_v41 = vpop.f32.mrb[6].mxu1 }
 0x39e   :  { %v344_v42 = vadd.f32 %v340_v41, %v122_v40  ;;  %v2718_v43 = vpop.f32.mrb[7].mxu1 }
 0x3a0   :  { %3148 = vtanh.f32 %v344_v42  ;;  %v2496_v45 = vmul.f32 -1.442695, %v344_v42 }
 0x3a2   :  { %3150 = vpow2.f32 %v2496_v45 }
 0x3aa   :  { %v3149_v44 = vpop.eup %3148 }
 0x3ab   :  { %354 = vrot.lane.b32.xlu0 %v3149_v44, %s3271_s5  ;;  %v137_v44 = vadd.f32 %v3357_v18, %v3352_v16 }
 0x3ac   :  { %v3151_v46 = vpop.eup %3150 }
 0x3ad   :  { %v348_v47 = vadd.f32 1.0, %v3151_v46 }
 0x3af   :  { %3152 = vrcp.f32 %v348_v47 }
 0x3b9   :  { %v3153_v48 = vpop.eup %3152 }
 0x3ba   :  { %v352_v51 = vmul.f32 %v3153_v48, %v260_v35 }
 0x41d   :  { %v355_v49 = vpop.permute.xlu0 %354 }
 0x41e   :  { %v357_v50 = vmul.f32 %v3153_v48, %v355_v49 }
 0x420   :  { %359 = vrot.lane.b32.xlu1 %v357_v50, %s3272_s6 }
 0x492   :  { %v360_v52 = vpop.permute.xlu1 %359 }
 0x493   :  { %v362_v53 = vadd.f32 %v360_v52, %v352_v51 }
 0x495   :  { %3154 = vtanh.f32 %v362_v53 }
 0x49f   :  { %v3155_v56 = vpop.eup %3154 }
 0x4a0   :  { %365 = vrot.lane.b32.xlu0 %v3155_v56, %s3271_s5 }
 0x512   :  { %v366_v57 = vpop.permute.xlu0 %365 }
 0x513   :  { %v368_v58 = vmul.f32 %v3153_v48, %v366_v57 }
 0x515   :  { %372 = vrot.lane.b32.xlu1 %v368_v58, %s3272_s6 }
 0x587   :  { %v3393_v61 = vpop.permute.xlu1 %372 }
 0x588   :  { %2728 = vmatmul.mubr.msk.f32.vlgmr.msra.gmra.mrb[4].mxu0 %vm168_vm2, %v3393_v61 }
 0x589   :  { %3007 = vmatpush3.bf16.msra.mxu0 %v3307_v6  ;;  %2749 = vmatprep.mubr.msk.f32.mxu0 %vm3269_vm1, %v3270_v14 }
 0x58a   :  { %3008 = vmatprep.subr.bf16.mxu0 %v3268_v8 }
 0x58d   :  { %3010 = vmatpush3.bf16.msra.mxu0 %v3328_v13 }
 0x58e   :  { %3017 = vmatprep.subr.bf16.mxu0 %v3268_v8 }
 0x65b   :  { %v442_v63 = vpop.f32.mrb[4].mxu0 }
 0x65c   :  { %v446_v0 = vadd.f32 %v442_v63, %v127_v62  ;;  %v2729_v1 = vpop.f32.mrb[5].mxu0  ;;  %v142_v62 = vadd.f32 %v3350_v15, %v3357_v18 }
 0x65e   :  { %3156 = vtanh.f32 %v446_v0  ;;  %v2498_v3 = vmul.f32 -1.442695, %v446_v0 }
 0x660   :  { %3158 = vpow2.f32 %v2498_v3 }
 0x668   :  { %v3157_v2 = vpop.eup %3156 }
 0x669   :  { %456 = vrot.lane.b32.xlu0 %v3157_v2, %s3271_s5 }
 0x66a   :  { %v3159_v4 = vpop.eup %3158 }
 0x66b   :  { %v450_v5 = vadd.f32 1.0, %v3159_v4 }
 0x66d   :  { %3160 = vrcp.f32 %v450_v5 }
 0x677   :  { %v3161_v7 = vpop.eup %3160 }
 0x678   :  { %v454_v11 = vmul.f32 %v3161_v7, %v362_v53 }
 0x6db   :  { %v457_v9 = vpop.permute.xlu0 %456 }
 0x6dc   :  { %v459_v10 = vmul.f32 %v3161_v7, %v457_v9 }
 0x6de   :  { %461 = vrot.lane.b32.xlu1 %v459_v10, %s3272_s6 }
 0x750   :  { %v462_v12 = vpop.permute.xlu1 %461 }
 0x751   :  { %v464_v17 = vadd.f32 %v462_v12, %v454_v11 }
 0x753   :  { %3162 = vtanh.f32 %v464_v17 }
 0x75d   :  { %v3163_v20 = vpop.eup %3162 }
 0x75e   :  { %467 = vrot.lane.b32.xlu0 %v3163_v20, %s3271_s5 }
 0x7d0   :  { %v468_v22 = vpop.permute.xlu0 %467 }
 0x7d1   :  { %v470_v23 = vmul.f32 %v3161_v7, %v468_v22  ;;  %v147_v22 = vadd.f32 %v3357_v18, %v3361_v21 }
 0x7d3   :  { %474 = vrot.lane.b32.xlu1 %v470_v23, %s3272_s6 }
 0x845   :  { %v3408_v24 = vpop.permute.xlu1 %474 }
 0x846   :  { %2739 = vmatmul.mubr.msk.f32.vlgmr.msra.gmra.mrb[8].mxu1 %vm168_vm2, %v3408_v24 }
 0x847   :  { %3013 = vmatpush3.bf16.msra.mxu1 %v3307_v6  ;;  %2760 = vmatprep.mubr.msk.f32.mxu1 %vm3269_vm1, %v3270_v14 }
 0x848   :  { %3014 = vmatprep.subr.bf16.mxu1 %v3268_v8 }
 0x84b   :  { %3016 = vmatpush3.bf16.msra.mxu1 %v3328_v13 }
 0x84c   :  { %3023 = vmatprep.subr.bf16.mxu1 %v3268_v8 }
 0x919   :  { %v544_v26 = vpop.f32.mrb[8].mxu1 }
 0x91a   :  { %v548_v27 = vadd.f32 %v544_v26, %v132_v25  ;;  %v2740_v28 = vpop.f32.mrb[9].mxu1 }
 0x91c   :  { %3164 = vtanh.f32 %v548_v27  ;;  %v2500_v30 = vmul.f32 -1.442695, %v548_v27 }
 0x91e   :  { %3166 = vpow2.f32 %v2500_v30 }
 0x926   :  { %v3165_v29 = vpop.eup %3164 }
 0x927   :  { %558 = vrot.lane.b32.xlu0 %v3165_v29, %s3271_s5 }
 0x928   :  { %v3167_v31 = vpop.eup %3166 }
 0x929   :  { %v552_v32 = vadd.f32 1.0, %v3167_v31 }
 0x92b   :  { %3168 = vrcp.f32 %v552_v32 }
 0x935   :  { %v3169_v33 = vpop.eup %3168 }
 0x936   :  { %v556_v36 = vmul.f32 %v3169_v33, %v464_v17 }
 0x999   :  { %v559_v34 = vpop.permute.xlu0 %558 }
 0x99a   :  { %v561_v35 = vmul.f32 %v3169_v33, %v559_v34 }
 0x99c   :  { %563 = vrot.lane.b32.xlu1 %v561_v35, %s3272_s6 }
 0xa0e   :  { %v564_v37 = vpop.permute.xlu1 %563 }
 0xa0f   :  { %v566_v38 = vadd.f32 %v564_v37, %v556_v36  ;;  %v985_v37 = vld [vmem:[%s3739_s1 + $0x50] sm:$0xff] }
 0xa11   :  { %3170 = vtanh.f32 %v566_v38 }
 0xa1b   :  { %v3171_v40 = vpop.eup %3170 }
 0xa1c   :  { %569 = vrot.lane.b32.xlu0 %v3171_v40, %s3271_s5 }
 0xa8e   :  { %v570_v41 = vpop.permute.xlu0 %569 }
 0xa8f   :  { %v572_v42 = vmul.f32 %v3169_v33, %v570_v41  ;;  %v987_v41 = vld [vmem:[%s3739_s1 + $0x60] sm:$0xff] }
 0xa91   :  { %576 = vrot.lane.b32.xlu1 %v572_v42, %s3272_s6  ;;  %v988_v42 = vld [vmem:[%s3739_s1 + $0x68] sm:$0xff] }
 0xb03   :  { %v3423_v43 = vpop.permute.xlu1 %576 }
 0xb04   :  { %2750 = vmatmul.mubr.msk.f32.vlgmr.msra.gmra.mrb[6].mxu0 %vm168_vm2, %v3423_v43 }
 0xb05   :  { %3019 = vmatpush3.bf16.msra.mxu0 %v3307_v6  ;;  %2771 = vmatprep.mubr.msk.f32.mxu0 %vm3269_vm1, %v3270_v14 }
 0xb06   :  { %3020 = vmatprep.subr.bf16.mxu0 %v3268_v8 }
 0xb09   :  { %3022 = vmatpush3.bf16.msra.mxu0 %v3328_v13 }
 0xb0a   :  { %3029 = vmatprep.subr.bf16.mxu0 %v3268_v8 }
 0xbd7   :  { %v646_v45 = vpop.f32.mrb[6].mxu0 }
 0xbd8   :  { %v650_v46 = vadd.f32 %v646_v45, %v137_v44  ;;  %v2751_v47 = vpop.f32.mrb[7].mxu0  ;;  %v3485_v44 = vpack.c.bf16 %v988_v42, %v987_v41 }
 0xbd9   :  { %v981_v47 = vld [vmem:[%s3739_s1 + $0x30] sm:$0xff] }
 0xbda   :  { %3172 = vtanh.f32 %v650_v46  ;;  %v2502_v49 = vmul.f32 -1.442695, %v650_v46 }
 0xbdc   :  { %3174 = vpow2.f32 %v2502_v49 }
 0xbe4   :  { %v3173_v48 = vpop.eup %3172 }
 0xbe5   :  { %660 = vrot.lane.b32.xlu0 %v3173_v48, %s3271_s5  ;;  %v982_v48 = vld [vmem:[%s3739_s1 + $0x38] sm:$0xff] }
 0xbe6   :  { %v3175_v50 = vpop.eup %3174  ;;  %v3036_v49 = vpack.c.bf16 %v982_v48, %v981_v47 }
 0xbe7   :  { %v654_v51 = vadd.f32 1.0, %v3175_v50  ;;  %v983_v50 = vld [vmem:[%s3739_s1 + $0x40] sm:$0xff] }
 0xbe9   :  { %3176 = vrcp.f32 %v654_v51  ;;  %v984_v51 = vld [vmem:[%s3739_s1 + $0x48] sm:$0xff] }
 0xbf3   :  { %v3177_v52 = vpop.eup %3176 }
 0xbf4   :  { %v658_v55 = vmul.f32 %v3177_v52, %v566_v38  ;;  %v986_v38 = vld [vmem:[%s3739_s1 + $0x58] sm:$0xff] }
 0xbf5   :  { %v3475_v40 = vpack.c.bf16 %v986_v38, %v985_v37 }
 0xc57   :  { %v661_v53 = vpop.permute.xlu0 %660 }
 0xc58   :  { %v663_v54 = vmul.f32 %v3177_v52, %v661_v53  ;;  %v3039_v53 = vpack.c.bf16 %v984_v51, %v983_v50 }
 0xc5a   :  { %665 = vrot.lane.b32.xlu1 %v663_v54, %s3272_s6 }
 0xccc   :  { %v666_v56 = vpop.permute.xlu1 %665 }
 0xccd   :  { %v668_v16 = vadd.f32 %v666_v56, %v658_v55  ;;  %v3561_v56 = vld [vmem:[%s3739_s1 + $0x70] ss:$0 sm:$0xff] }
 0xccf   :  { %3178 = vtanh.f32 %v668_v16 }
 0xcd9   :  { %v3179_v57 = vpop.eup %3178 }
 0xcda   :  { %671 = vrot.lane.b32.xlu0 %v3179_v57, %s3271_s5 }
 0xd4c   :  { %v672_v58 = vpop.permute.xlu0 %671 }
 0xd4d   :  { %v674_v59 = vmul.f32 %v3177_v52, %v672_v58 }
 0xd4f   :  { %678 = vrot.lane.b32.xlu1 %v674_v59, %s3272_s6 }
 0xdc1   :  { %v3439_v60 = vpop.permute.xlu1 %678 }
 0xdc2   :  { %2761 = vmatmul.mubr.msk.f32.vlgmr.msra.gmra.mrb[10].mxu1 %vm168_vm2, %v3439_v60 }
 0xdc3   :  { %3025 = vmatpush3.bf16.msra.mxu1 %v3307_v6  ;;  %2782 = vmatprep.mubr.msk.f32.mxu1 %vm3269_vm1, %v3270_v14 }
 0xdc4   :  { %3026 = vmatprep.subr.bf16.mxu1 %v3268_v8 }
 0xdc7   :  { %3028 = vmatpush3.bf16.msra.mxu1 %v3328_v13 }
 0xdc8   :  { %3035 = vmatprep.subr.bf16.mxu1 %v3268_v8 }
 0xe95   :  { %v748_v63 = vpop.f32.mrb[10].mxu1 }
 0xe96   :  { %v752_v0 = vadd.f32 %v748_v63, %v142_v62  ;;  %v2762_v1 = vpop.f32.mrb[11].mxu1 }
 0xe98   :  { %3180 = vtanh.f32 %v752_v0  ;;  %v2504_v6 = vmul.f32 -1.442695, %v752_v0 }
 0xe9a   :  { %3182 = vpow2.f32 %v2504_v6 }
 0xea2   :  { %v3181_v2 = vpop.eup %3180 }
 0xea3   :  { %762 = vrot.lane.b32.xlu0 %v3181_v2, %s3271_s5 }
 0xea4   :  { %v3183_v3 = vpop.eup %3182 }
 0xea5   :  { %v756_v4 = vadd.f32 1.0, %v3183_v3 }
 0xea7   :  { %3184 = vrcp.f32 %v756_v4 }
 0xeb1   :  { %v3185_v5 = vpop.eup %3184 }
 0xeb2   :  { %v760_v9 = vmul.f32 %v3185_v5, %v668_v16 }
 0xf15   :  { %v763_v7 = vpop.permute.xlu0 %762 }
 0xf16   :  { %v765_v13 = vmul.f32 %v3185_v5, %v763_v7 }
 0xf18   :  { %767 = vrot.lane.b32.xlu1 %v765_v13, %s3272_s6 }
 0xf8a   :  { %v768_v10 = vpop.permute.xlu1 %767 }
 0xf8b   :  { %v770_v15 = vadd.f32 %v768_v10, %v760_v9 }
 0xf8d   :  { %3186 = vtanh.f32 %v770_v15 }
 0xf97   :  { %v3187_v11 = vpop.eup %3186 }
 0xf98   :  { %773 = vrot.lane.b32.xlu0 %v3187_v11, %s3271_s5 }
0x100a   :  { %v774_v12 = vpop.permute.xlu0 %773 }
0x100b   :  { %v776_v17 = vmul.f32 %v3185_v5, %v774_v12 }
0x100d   :  { %780 = vrot.lane.b32.xlu1 %v776_v17, %s3272_s6 }
0x107f   :  { %v3455_v20 = vpop.permute.xlu1 %780 }
0x1080   :  { %2772 = vmatmul.mubr.msk.f32.vlgmr.msra.gmra.mrb[8].mxu0 %vm168_vm2, %v3455_v20 }
0x1081   :  { %2793 = vmatprep.mubr.msk.f32.mxu0 %vm3269_vm1, %v3270_v14  ;;  %3031 = vmatpush3.bf16.msra.mxu0 %v3475_v40 }
0x1082   :  { %3032 = vmatprep.subr.bf16.mxu0 %v3268_v8 }
0x1085   :  { %3034 = vmatpush3.bf16.msra.mxu0 %v3485_v44 }
0x1086   :  { %3041 = vmatprep.subr.bf16.mxu0 %v3268_v8 }
0x1088   :  { %2794 = vmatmul.mubr.f32.vlgmr.msra.gmra.mrb[10].mxu0 %v3270_v14 }
0x1089   :  { %3043 = vmatpush3.bf16.msra.mxu0 %v3475_v40  ;;  %2815 = vmatprep.mubr.msk.f32.mxu0 %vm3269_vm1, %v3270_v14 }
0x108a   :  { %3044 = vmatprep.subr.bf16.mxu0 %v3268_v8 }
0x108d   :  { %3046 = vmatpush3.bf16.msra.mxu0 %v3485_v44 }
0x108e   :  { %3053 = vmatprep.subr.bf16.mxu0 %v3268_v8 }
0x1153   :  { %v850_v23 = vpop.f32.mrb[8].mxu0 }
0x1154   :  { %v854_v25 = vadd.f32 %v850_v23, %v147_v22  ;;  %v2773_v26 = vpop.f32.mrb[9].mxu0 }
0x1156   :  { %3188 = vtanh.f32 %v854_v25  ;;  %v2506_v28 = vmul.f32 -1.442695, %v854_v25 }
0x1158   :  { %3190 = vpow2.f32 %v2506_v28 }
0x1160   :  { %v3189_v27 = vpop.eup %3188 }
0x1161   :  { %864 = vrot.lane.b32.xlu0 %v3189_v27, %s3271_s5 }
0x1162   :  { %v3191_v29 = vpop.eup %3190 }
0x1163   :  { %v858_v30 = vadd.f32 1.0, %v3191_v29 }
0x1165   :  { %3192 = vrcp.f32 %v858_v30 }
0x116f   :  { %v3193_v31 = vpop.eup %3192 }
0x1170   :  { %v862_v34 = vmul.f32 %v3193_v31, %v770_v15 }
0x11d3   :  { %v865_v32 = vpop.permute.xlu0 %864 }
0x11d4   :  { %v867_v33 = vmul.f32 %v3193_v31, %v865_v32 }
0x11d6   :  { %869 = vrot.lane.b32.xlu1 %v867_v33, %s3272_s6 }
0x1248   :  { %v870_v35 = vpop.permute.xlu1 %869 }
0x1249   :  { %v3465_v21 = vadd.f32 %v870_v35, %v862_v34 }
0x124b   :  { %3194 = vtanh.f32 %v3465_v21 }
0x1255   :  { %v3195_v36 = vpop.eup %3194 }
0x1256   :  { %875 = vrot.lane.b32.xlu0 %v3195_v36, %s3271_s5 }
0x12c8   :  { %v876_v45 = vpop.permute.xlu0 %875 }
0x12c9   :  { %v878_v46 = vmul.f32 %v3193_v31, %v876_v45 }
0x12cb   :  { %882 = vrot.lane.b32.xlu1 %v878_v46, %s3272_s6 }
0x133d   :  { %v883_v52 = vpop.permute.xlu1 %882 }
0x133e   :  { %2783 = vmatmul.mubr.msk.f32.vlgmr.msra.gmra.mrb[12].mxu1 %vm168_vm2, %v883_v52 }
0x133f   :  { %3037 = vmatpush3.bf16.msra.mxu1 %v3036_v49  ;;  %2804 = vmatprep.mubr.msk.f32.mxu1 %vm3269_vm1, %v3270_v14 }
0x1340   :  { %3038 = vmatprep.subr.bf16.mxu1 %v3268_v8 }
0x1343   :  { %3040 = vmatpush3.bf16.msra.mxu1 %v3039_v53 }
0x1344   :  { %3047 = vmatprep.subr.bf16.mxu1 %v3268_v8 }
0x1346   :  { %2805 = vmatmul.mubr.msk.f32.vlgmr.msra.gmra.mrb[14].mxu1 %vm168_vm2, %v3368_v39  ;;  %v1056_v39 = vpop.f32.mrb[10].mxu0 }
0x1347   :  { %3049 = vmatpush3.bf16.msra.mxu1 %v3036_v49  ;;  %2826 = vmatprep.mubr.msk.f32.mxu1 %vm3269_vm1, %v3270_v14 }
0x1348   :  { %3050 = vmatprep.subr.bf16.mxu1 %v3268_v8 }
0x134b   :  { %3052 = vmatpush3.bf16.msra.mxu1 %v3039_v53 }
0x134c   :  { %3059 = vmatprep.subr.bf16.mxu1 %v3268_v8 }
0x134e   :  { %2827 = vmatmul.mubr.msk.f32.vlgmr.msra.gmra.mrb[16].mxu1 %vm168_vm2, %v3393_v61  ;;  %v2795_v61 = vpop.f32.mrb[11].mxu0 }
0x134f   :  { %3061 = vmatpush3.bf16.msra.mxu1 %v3036_v49  ;;  %2848 = vmatprep.mubr.msk.f32.mxu1 %vm3269_vm1, %v3270_v14 }
0x1350   :  { %3062 = vmatprep.subr.bf16.mxu1 %v3268_v8 }
0x1353   :  { %3064 = vmatpush3.bf16.msra.mxu1 %v3039_v53 }
0x1354   :  { %3071 = vmatprep.subr.bf16.mxu1 %v3268_v8 }
0x1356   :  { %2849 = vmatmul.mubr.msk.f32.vlgmr.msra.gmra.mrb[18].mxu1 %vm168_vm2, %v3408_v24  ;;  %v152_v24 = vadd.f32 %v3359_v19, %v3357_v18 }
0x1357   :  { %3073 = vmatpush3.bf16.msra.mxu1 %v3036_v49  ;;  %2870 = vmatprep.mubr.msk.f32.mxu1 %vm3269_vm1, %v3270_v14 }
0x1358   :  { %3074 = vmatprep.subr.bf16.mxu1 %v3268_v8 }
0x135b   :  { %3076 = vmatpush3.bf16.msra.mxu1 %v3039_v53 }
0x135c   :  { %3083 = vmatprep.subr.bf16.mxu1 %v3268_v8 }
0x135e   :  { %2871 = vmatmul.mubr.msk.f32.vlgmr.msra.gmra.mrb[20].mxu1 %vm168_vm2, %v3423_v43 }
0x135f   :  { %3085 = vmatpush3.bf16.msra.mxu1 %v3036_v49  ;;  %2892 = vmatprep.mubr.msk.f32.mxu1 %vm3269_vm1, %v3270_v14 }
0x1360   :  { %3086 = vmatprep.subr.bf16.mxu1 %v3268_v8 }
0x1363   :  { %3088 = vmatpush3.bf16.msra.mxu1 %v3039_v53 }
0x1364   :  { %3095 = vmatprep.subr.bf16.mxu1 %v3268_v8 }
0x1366   :  { %2893 = vmatmul.mubr.msk.f32.vlgmr.msra.gmra.mrb[22].mxu1 %vm168_vm2, %v3439_v60 }
0x1367   :  { %3097 = vmatpush3.bf16.msra.mxu1 %v3036_v49  ;;  %2914 = vmatprep.mubr.msk.f32.mxu1 %vm3269_vm1, %v3270_v14 }
0x1368   :  { %3098 = vmatprep.subr.bf16.mxu1 %v3268_v8 }
0x136b   :  { %3100 = vmatpush3.bf16.msra.mxu1 %v3039_v53 }
0x136c   :  { %3107 = vmatprep.subr.bf16.mxu1 %v3268_v8 }
0x136e   :  { %2915 = vmatmul.mubr.msk.f32.vlgmr.msra.gmra.mrb[24].mxu1 %vm168_vm2, %v3455_v20 }
0x136f   :  { %3109 = vmatpush3.bf16.msra.mxu1 %v3036_v49  ;;  %2936 = vmatprep.mubr.msk.f32.mxu1 %vm3269_vm1, %v3270_v14 }
0x1370   :  { %3110 = vmatprep.subr.bf16.mxu1 %v3268_v8 }
0x1373   :  { %3112 = vmatpush3.bf16.msra.mxu1 %v3039_v53 }
0x1374   :  { %3119 = vmatprep.subr.bf16.mxu1 %v3268_v8 }
0x1376   :  { %2937 = vmatmul.mubr.msk.f32.vlgmr.msra.gmra.mrb[26].mxu1 %vm168_vm2, %v883_v52 }
0x1377   :  { %3121 = vmatpush3.bf16.msra.mxu1 %v3036_v49  ;;  %2958 = vmatprep.mubr.msk.f32.mxu1 %vm3269_vm1, %v3270_v14 }
0x1378   :  { %3122 = vmatprep.subr.bf16.mxu1 %v3268_v8 }
0x137b   :  { %3124 = vmatpush3.bf16.msra.mxu1 %v3039_v53 }
0x1411   :  { %v952_v43 = vpop.f32.mrb[12].mxu1 }
0x1412   :  { %v3556_v54 = vadd.f32 %v952_v43, %v152_v24  ;;  %v2784_v55 = vpop.f32.mrb[13].mxu1 }
0x1419   :  { %v1126_v16 = vpop.f32.mrb[14].mxu1 }
0x141a   :  { %v1127_v57 = vadd.f32 %v1126_v16, %v1056_v39  ;;  %v2806_v58 = vpop.f32.mrb[15].mxu1 }
0x141c   :  { %v1134_v59 = vadd.f32 %v3561_v56, %v1127_v57 }
0x141e   :  { %3196 = vtanh.f32 %v1134_v59  ;;  %v2511_v13 = vmul.f32 -1.442695, %v1134_v59 }
0x1420   :  { %3198 = vpow2.f32 %v2511_v13 }
0x1421   :  { %v1300_v60 = vpop.f32.mrb[16].mxu1 }
0x1422   :  { %v2828_v62 = vpop.f32.mrb[17].mxu1 }
0x1428   :  { %v3197_v63 = vpop.eup %3196 }
0x1429   :  { %1144 = vrot.lane.b32.xlu0 %v3197_v63, %s3271_s5  ;;  %v3565_v18 = vpop.f32.mrb[18].mxu1 }
0x142a   :  { %v2850_v19 = vpop.f32.mrb[19].mxu1  ;;  %v3199_v9 = vpop.eup %3198 }
0x142b   :  { %v1138_v10 = vadd.f32 1.0, %v3199_v9 }
0x142d   :  { %3200 = vrcp.f32 %v1138_v10 }
0x1431   :  { %v3567_v0 = vpop.f32.mrb[20].mxu1 }
0x1432   :  { %v2872_v1 = vpop.f32.mrb[21].mxu1 }
0x1437   :  { %v3201_v15 = vpop.eup %3200 }
0x1438   :  { %v1142_v17 = vmul.f32 0.0, %v3201_v15 }
0x1439   :  { %v3569_v2 = vpop.f32.mrb[22].mxu1 }
0x143a   :  { %v2894_v6 = vpop.f32.mrb[23].mxu1 }
0x1441   :  { %v3571_v3 = vpop.f32.mrb[24].mxu1 }
0x1442   :  { %v2916_v4 = vpop.f32.mrb[25].mxu1 }
0x1449   :  { %v3573_v5 = vpop.f32.mrb[26].mxu1 }
0x144a   :  { %v2938_v7 = vpop.f32.mrb[27].mxu1 }
0x149b   :  { %v1145_v11 = vpop.permute.xlu0 %1144 }
0x149c   :  { %v1147_v12 = vmul.f32 %v3201_v15, %v1145_v11 }
0x149e   :  { %1149 = vrot.lane.b32.xlu1 %v1147_v12, %s3272_s6 }
0x1510   :  { %v1150_v20 = vpop.permute.xlu1 %1149 }
0x1511   :  { %v1152_v22 = vadd.f32 %v1150_v20, %v1142_v17 }
0x1513   :  { %3202 = vtanh.f32 %v1152_v22 }
0x151d   :  { %v3203_v23 = vpop.eup %3202 }
0x151e   :  { %1155 = vrot.lane.b32.xlu0 %v3203_v23, %s3271_s5 }
0x1590   :  { %v1156_v25 = vpop.permute.xlu0 %1155 }
0x1591   :  { %v1158_v26 = vmul.f32 %v3201_v15, %v1156_v25 }
0x1593   :  { %1160 = vrot.lane.b32.xlu1 %v1158_v26, %s3272_s6 }
0x1605   :  { %v3578_v27 = vpop.permute.xlu1 %1160 }
0x1606   :  { %2816 = vmatmul.mubr.msk.f32.vlgmr.msra.gmra.mrb[12].mxu0 %vm168_vm2, %v3578_v27 }
0x1607   :  { %3055 = vmatpush3.bf16.msra.mxu0 %v3475_v40  ;;  %2837 = vmatprep.mubr.msk.f32.mxu0 %vm3269_vm1, %v3270_v14 }
0x1608   :  { %3056 = vmatprep.subr.bf16.mxu0 %v3268_v8 }
0x160b   :  { %3058 = vmatpush3.bf16.msra.mxu0 %v3485_v44 }
0x160c   :  { %3065 = vmatprep.subr.bf16.mxu0 %v3268_v8 }
0x16d9   :  { %v1230_v28 = vpop.f32.mrb[12].mxu0 }
0x16da   :  { %v1301_v29 = vadd.f32 %v1300_v60, %v1230_v28  ;;  %v2817_v30 = vpop.f32.mrb[13].mxu0 }
0x16dc   :  { %v1304_v31 = vadd.f32 %v3561_v56, %v1301_v29 }
0x16de   :  { %3204 = vtanh.f32 %v1304_v31  ;;  %v2514_v33 = vmul.f32 -1.442695, %v1304_v31 }
0x16e0   :  { %3206 = vpow2.f32 %v2514_v33 }
0x16e8   :  { %v3205_v32 = vpop.eup %3204 }
0x16e9   :  { %1314 = vrot.lane.b32.xlu0 %v3205_v32, %s3271_s5 }
0x16ea   :  { %v3207_v34 = vpop.eup %3206 }
0x16eb   :  { %v1308_v35 = vadd.f32 1.0, %v3207_v34 }
0x16ed   :  { %3208 = vrcp.f32 %v1308_v35 }
0x16f7   :  { %v3209_v36 = vpop.eup %3208 }
0x16f8   :  { %v1312_v41 = vmul.f32 %v3209_v36, %v1152_v22 }
0x175b   :  { %v1315_v37 = vpop.permute.xlu0 %1314 }
0x175c   :  { %v1317_v38 = vmul.f32 %v3209_v36, %v1315_v37 }
0x175e   :  { %1319 = vrot.lane.b32.xlu1 %v1317_v38, %s3272_s6 }
0x17d0   :  { %v1320_v42 = vpop.permute.xlu1 %1319 }
0x17d1   :  { %v1322_v45 = vadd.f32 %v1320_v42, %v1312_v41 }
0x17d3   :  { %3210 = vtanh.f32 %v1322_v45 }
0x17dd   :  { %v3211_v46 = vpop.eup %3210 }
0x17de   :  { %1325 = vrot.lane.b32.xlu0 %v3211_v46, %s3271_s5 }
0x1850   :  { %v1326_v47 = vpop.permute.xlu0 %1325 }
0x1851   :  { %v1328_v48 = vmul.f32 %v3209_v36, %v1326_v47 }
0x1853   :  { %1330 = vrot.lane.b32.xlu1 %v1328_v48, %s3272_s6 }
0x18c5   :  { %v3593_v49 = vpop.permute.xlu1 %1330 }
0x18c6   :  { %2838 = vmatmul.mubr.msk.f32.vlgmr.msra.gmra.mrb[14].mxu0 %vm168_vm2, %v3593_v49 }
0x18c7   :  { %3067 = vmatpush3.bf16.msra.mxu0 %v3475_v40  ;;  %2859 = vmatprep.mubr.msk.f32.mxu0 %vm3269_vm1, %v3270_v14 }
0x18c8   :  { %3068 = vmatprep.subr.bf16.mxu0 %v3268_v8 }
0x18cb   :  { %3070 = vmatpush3.bf16.msra.mxu0 %v3485_v44 }
0x18cc   :  { %3077 = vmatprep.subr.bf16.mxu0 %v3268_v8 }
0x1999   :  { %v1400_v50 = vpop.f32.mrb[14].mxu0 }
0x199a   :  { %v1471_v51 = vadd.f32 %v3565_v18, %v1400_v50  ;;  %v2839_v52 = vpop.f32.mrb[15].mxu0 }
0x199c   :  { %v1474_v53 = vadd.f32 %v3561_v56, %v1471_v51 }
0x199e   :  { %3212 = vtanh.f32 %v1474_v53  ;;  %v2517_v61 = vmul.f32 -1.442695, %v1474_v53 }
0x19a0   :  { %3214 = vpow2.f32 %v2517_v61 }
0x19a8   :  { %v3213_v39 = vpop.eup %3212 }
0x19a9   :  { %1484 = vrot.lane.b32.xlu0 %v3213_v39, %s3271_s5 }
0x19aa   :  { %v3215_v24 = vpop.eup %3214 }
0x19ab   :  { %v1478_v43 = vadd.f32 1.0, %v3215_v24 }
0x19ad   :  { %3216 = vrcp.f32 %v1478_v43 }
0x19b7   :  { %v3217_v55 = vpop.eup %3216 }
0x19b8   :  { %v1482_v58 = vmul.f32 %v3217_v55, %v1322_v45 }
0x1a1b   :  { %v1485_v16 = vpop.permute.xlu0 %1484 }
0x1a1c   :  { %v1487_v57 = vmul.f32 %v3217_v55, %v1485_v16 }
0x1a1e   :  { %1489 = vrot.lane.b32.xlu1 %v1487_v57, %s3272_s6 }
0x1a90   :  { %v1490_v59 = vpop.permute.xlu1 %1489 }
0x1a91   :  { %v1492_v60 = vadd.f32 %v1490_v59, %v1482_v58 }
0x1a93   :  { %3218 = vtanh.f32 %v1492_v60 }
0x1a9d   :  { %v3219_v62 = vpop.eup %3218 }
0x1a9e   :  { %1495 = vrot.lane.b32.xlu0 %v3219_v62, %s3271_s5 }
0x1b10   :  { %v1496_v63 = vpop.permute.xlu0 %1495 }
0x1b11   :  { %v1498_v18 = vmul.f32 %v3217_v55, %v1496_v63 }
0x1b13   :  { %1500 = vrot.lane.b32.xlu1 %v1498_v18, %s3272_s6  ;;  %v2508_v18 = vmul.f32 -1.442695, %v3556_v54 }
0x1b85   :  { %v3609_v19 = vpop.permute.xlu1 %1500 }
0x1b86   :  { %2860 = vmatmul.mubr.msk.f32.vlgmr.msra.gmra.mrb[16].mxu0 %vm168_vm2, %v3609_v19 }
0x1b87   :  { %3079 = vmatpush3.bf16.msra.mxu0 %v3475_v40  ;;  %2881 = vmatprep.mubr.msk.f32.mxu0 %vm3269_vm1, %v3270_v14 }
0x1b88   :  { %3080 = vmatprep.subr.bf16.mxu0 %v3268_v8 }
0x1b8b   :  { %3082 = vmatpush3.bf16.msra.mxu0 %v3485_v44 }
0x1b8c   :  { %3089 = vmatprep.subr.bf16.mxu0 %v3268_v8 }
0x1c59   :  { %v1570_v1 = vpop.f32.mrb[16].mxu0 }
0x1c5a   :  { %v1641_v6 = vadd.f32 %v3567_v0, %v1570_v1  ;;  %v2861_v4 = vpop.f32.mrb[17].mxu0 }
0x1c5c   :  { %v1644_v7 = vadd.f32 %v3561_v56, %v1641_v6 }
0x1c5e   :  { %3220 = vtanh.f32 %v1644_v7  ;;  %v2520_v9 = vmul.f32 -1.442695, %v1644_v7 }
0x1c60   :  { %3222 = vpow2.f32 %v2520_v9 }
0x1c68   :  { %v3221_v13 = vpop.eup %3220 }
0x1c69   :  { %1654 = vrot.lane.b32.xlu0 %v3221_v13, %s3271_s5 }
0x1c6a   :  { %v3223_v10 = vpop.eup %3222 }
0x1c6b   :  { %v1648_v15 = vadd.f32 1.0, %v3223_v10 }
0x1c6d   :  { %3224 = vrcp.f32 %v1648_v15 }
0x1c77   :  { %v3225_v11 = vpop.eup %3224 }
0x1c78   :  { %v1652_v20 = vmul.f32 %v3225_v11, %v1492_v60 }
0x1cdb   :  { %v1655_v12 = vpop.permute.xlu0 %1654 }
0x1cdc   :  { %v1657_v17 = vmul.f32 %v3225_v11, %v1655_v12 }
0x1cde   :  { %1659 = vrot.lane.b32.xlu1 %v1657_v17, %s3272_s6 }
0x1d50   :  { %v1660_v22 = vpop.permute.xlu1 %1659 }
0x1d51   :  { %v1662_v0 = vadd.f32 %v1660_v22, %v1652_v20 }
0x1d53   :  { %3226 = vtanh.f32 %v1662_v0 }
0x1d5d   :  { %v3227_v23 = vpop.eup %3226 }
0x1d5e   :  { %1665 = vrot.lane.b32.xlu0 %v3227_v23, %s3271_s5 }
0x1dd0   :  { %v1666_v25 = vpop.permute.xlu0 %1665 }
0x1dd1   :  { %v1668_v26 = vmul.f32 %v3225_v11, %v1666_v25 }
0x1dd3   :  { %1670 = vrot.lane.b32.xlu1 %v1668_v26, %s3272_s6 }
0x1e45   :  { %v3625_v28 = vpop.permute.xlu1 %1670 }
0x1e46   :  { %2882 = vmatmul.mubr.msk.f32.vlgmr.msra.gmra.mrb[18].mxu0 %vm168_vm2, %v3625_v28 }
0x1e47   :  { %3091 = vmatpush3.bf16.msra.mxu0 %v3475_v40  ;;  %2903 = vmatprep.mubr.msk.f32.mxu0 %vm3269_vm1, %v3270_v14 }
0x1e48   :  { %3092 = vmatprep.subr.bf16.mxu0 %v3268_v8 }
0x1e4b   :  { %3094 = vmatpush3.bf16.msra.mxu0 %v3485_v44 }
0x1e4c   :  { %3101 = vmatprep.subr.bf16.mxu0 %v3268_v8 }
0x1f19   :  { %v1740_v29 = vpop.f32.mrb[18].mxu0 }
0x1f1a   :  { %v1811_v30 = vadd.f32 %v3569_v2, %v1740_v29  ;;  %v2883_v31 = vpop.f32.mrb[19].mxu0 }
0x1f1b   :  { %v2354_v31 = vld [vmem:[%s3739_s1 + $0x78] sm:$0xff] }
0x1f1c   :  { %v1814_v32 = vadd.f32 %v3561_v56, %v1811_v30 }
0x1f1e   :  { %3228 = vtanh.f32 %v1814_v32  ;;  %v2523_v34 = vmul.f32 -1.442695, %v1814_v32  ;;  %v2355_v32 = vld [vmem:[%s3739_s1 + $0x80] sm:$0xff] }
0x1f20   :  { %3230 = vpow2.f32 %v2523_v34 }
0x1f28   :  { %v3229_v33 = vpop.eup %3228 }
0x1f29   :  { %1824 = vrot.lane.b32.xlu0 %v3229_v33, %s3271_s5  ;;  %v3125_v33 = vpack.c.bf16 %v2355_v32, %v2354_v31 }
0x1f2a   :  { %v3231_v35 = vpop.eup %3230 }
0x1f2b   :  { %v1818_v36 = vadd.f32 1.0, %v3231_v35 }
0x1f2d   :  { %3232 = vrcp.f32 %v1818_v36 }
0x1f37   :  { %v3233_v37 = vpop.eup %3232 }
0x1f38   :  { %v1822_v42 = vmul.f32 %v3233_v37, %v1662_v0 }
0x1f9b   :  { %v1825_v38 = vpop.permute.xlu0 %1824 }
0x1f9c   :  { %v1827_v41 = vmul.f32 %v3233_v37, %v1825_v38 }
0x1f9e   :  { %1829 = vrot.lane.b32.xlu1 %v1827_v41, %s3272_s6 }
0x2010   :  { %v1830_v45 = vpop.permute.xlu1 %1829 }
0x2011   :  { %v1832_v2 = vadd.f32 %v1830_v45, %v1822_v42  ;;  %v2356_v42 = vld [vmem:[%s3739_s1 + $0x88] sm:$0xff]  ;;  %v2357_v45 = vld [vmem:[%s3739_s1 + $0x90] sm:$0xff] }
0x2013   :  { %3234 = vtanh.f32 %v1832_v2 }
0x201d   :  { %v3235_v46 = vpop.eup %3234 }
0x201e   :  { %1835 = vrot.lane.b32.xlu0 %v3235_v46, %s3271_s5 }
0x2090   :  { %v1836_v47 = vpop.permute.xlu0 %1835 }
0x2091   :  { %v1838_v48 = vmul.f32 %v3233_v37, %v1836_v47 }
0x2093   :  { %1840 = vrot.lane.b32.xlu1 %v1838_v48, %s3272_s6 }
0x2105   :  { %v3641_v50 = vpop.permute.xlu1 %1840 }
0x2106   :  { %2904 = vmatmul.mubr.msk.f32.vlgmr.msra.gmra.mrb[20].mxu0 %vm168_vm2, %v3641_v50 }
0x2107   :  { %3103 = vmatpush3.bf16.msra.mxu0 %v3475_v40  ;;  %2925 = vmatprep.mubr.msk.f32.mxu0 %vm3269_vm1, %v3270_v14 }
0x2108   :  { %3104 = vmatprep.subr.bf16.mxu0 %v3268_v8 }
0x210b   :  { %3106 = vmatpush3.bf16.msra.mxu0 %v3485_v44 }
0x210c   :  { %3113 = vmatprep.subr.bf16.mxu0 %v3268_v8 }
0x21d9   :  { %v1910_v51 = vpop.f32.mrb[20].mxu0 }
0x21da   :  { %v1981_v52 = vadd.f32 %v3571_v3, %v1910_v51  ;;  %v2905_v53 = vpop.f32.mrb[21].mxu0 }
0x21dc   :  { %v1984_v39 = vadd.f32 %v3561_v56, %v1981_v52 }
0x21de   :  { %3236 = vtanh.f32 %v1984_v39  ;;  %v2526_v24 = vmul.f32 -1.442695, %v1984_v39 }
0x21e0   :  { %3238 = vpow2.f32 %v2526_v24 }
0x21e8   :  { %v3237_v61 = vpop.eup %3236 }
0x21e9   :  { %1994 = vrot.lane.b32.xlu0 %v3237_v61, %s3271_s5 }
0x21ea   :  { %v3239_v43 = vpop.eup %3238 }
0x21eb   :  { %v1988_v55 = vadd.f32 1.0, %v3239_v43 }
0x21ed   :  { %3240 = vrcp.f32 %v1988_v55 }
0x21f7   :  { %v3241_v16 = vpop.eup %3240 }
0x21f8   :  { %v1992_v59 = vmul.f32 %v3241_v16, %v1832_v2  ;;  %v3129_v2 = vpack.c.bf16 %v2357_v45, %v2356_v42 }
0x225b   :  { %v1995_v57 = vpop.permute.xlu0 %1994 }
0x225c   :  { %v1997_v58 = vmul.f32 %v3241_v16, %v1995_v57 }
0x225e   :  { %1999 = vrot.lane.b32.xlu1 %v1997_v58, %s3272_s6 }
0x22d0   :  { %v2000_v60 = vpop.permute.xlu1 %1999 }
0x22d1   :  { %v2002_v3 = vadd.f32 %v2000_v60, %v1992_v59 }
0x22d3   :  { %3242 = vtanh.f32 %v2002_v3 }
0x22d4   :  { %3244 = vtanh.f32 %v3556_v54 }
0x22d5   :  { %3246 = vpow2.f32 %v2508_v18 }
0x22dd   :  { %v3243_v62 = vpop.eup %3242 }
0x22de   :  { %2005 = vrot.lane.b32.xlu0 %v3243_v62, %s3271_s5  ;;  %v3245_v63 = vpop.eup %3244 }
0x22df   :  { %v3247_v1 = vpop.eup %3246 }
0x22e0   :  { %v960_v6 = vadd.f32 1.0, %v3247_v1 }
0x22e2   :  { %966 = vrot.lane.b32.xlu0 %v3245_v63, %s3271_s5  ;;  %3248 = vrcp.f32 %v960_v6 }
0x22ec   :  { %v3249_v13 = vpop.eup %3248 }
0x22ed   :  { %v964_v54 = vmul.f32 %v3249_v13, %v3465_v21 }
0x2350   :  { %v2006_v4 = vpop.permute.xlu0 %2005 }
0x2351   :  { %v2008_v7 = vmul.f32 %v3241_v16, %v2006_v4 }
0x2353   :  { %2010 = vrot.lane.b32.xlu1 %v2008_v7, %s3272_s6 }
0x2354   :  { %v967_v9 = vpop.permute.xlu0 %966 }
0x2355   :  { %v969_v10 = vmul.f32 %v3249_v13, %v967_v9 }
0x2357   :  { %971 = vrot.lane.b32.xlu0 %v969_v10, %s3272_s6 }
0x23c5   :  { %v2011_v15 = vpop.permute.xlu1 %2010 }
0x23c6   :  { %2926 = vmatmul.mubr.msk.f32.vlgmr.msra.gmra.mrb[22].mxu0 %vm168_vm2, %v2011_v15 }
0x23c7   :  { %3115 = vmatpush3.bf16.msra.mxu0 %v3475_v40  ;;  %2947 = vmatprep.mubr.msk.f32.mxu0 %vm3269_vm1, %v3270_v14 }
0x23c8   :  { %3116 = vmatprep.subr.bf16.mxu0 %v3268_v8 }
0x23c9   :  { %v972_v11 = vpop.permute.xlu0 %971 }
0x23ca   :  { %v974_v12 = vadd.f32 %v972_v11, %v964_v54 }
0x23cb   :  { %3118 = vmatpush3.bf16.msra.mxu0 %v3485_v44 }
0x23cc   :  { %3250 = vtanh.f32 %v974_v12  ;;  %3126 = vmatprep.subr.bf16.mxu0 %v3125_v33 }
0x23d6   :  { %v3251_v17 = vpop.eup %3250 }
0x23d7   :  { %977 = vrot.lane.b32.xlu0 %v3251_v17, %s3271_s5 }
0x2449   :  { %v978_v35 = vpop.permute.xlu0 %977 }
0x244a   :  { %v980_v36 = vmul.f32 %v3249_v13, %v978_v35 }
0x2499   :  { %v2080_v20 = vpop.f32.mrb[22].mxu0 }
0x249a   :  { %v2151_v22 = vadd.f32 %v3573_v5, %v2080_v20  ;;  %v2927_v0 = vpop.f32.mrb[23].mxu0 }
0x249c   :  { %v2154_v40 = vadd.f32 %v3561_v56, %v2151_v22 }
0x249e   :  { %3252 = vtanh.f32 %v2154_v40  ;;  %v2529_v21 = vmul.f32 -1.442695, %v2154_v40 }
0x24a0   :  { %3254 = vpow2.f32 %v2529_v21 }
0x24a8   :  { %v3253_v14 = vpop.eup %3252 }
0x24a9   :  { %2164 = vrot.lane.b32.xlu1 %v3253_v14, %s3271_s5 }
0x24aa   :  { %v3255_v8 = vpop.eup %3254 }
0x24ab   :  { %v2158_v23 = vadd.f32 1.0, %v3255_v8 }
0x24ad   :  { %3256 = vrcp.f32 %v2158_v23 }
0x24b7   :  { %v3257_v44 = vpop.eup %3256 }
0x24b8   :  { %v2162_v29 = vmul.f32 %v3257_v44, %v2002_v3 }
0x251b   :  { %v2165_v25 = vpop.permute.xlu1 %2164 }
0x251c   :  { %v2167_v26 = vmul.f32 %v3257_v44, %v2165_v25 }
0x251e   :  { %2169 = vrot.lane.b32.xlu1 %v2167_v26, %s3272_s6 }
0x2590   :  { %v2170_v30 = vpop.permute.xlu1 %2169 }
0x2591   :  { %v3673_v5 = vadd.f32 %v2170_v30, %v2162_v29 }
0x2593   :  { %3258 = vtanh.f32 %v3673_v5 }
0x259d   :  { %v3259_v34 = vpop.eup %3258 }
0x259e   :  { %2175 = vrot.lane.b32.xlu1 %v3259_v34, %s3271_s5 }
0x25a2   :  { %2255 = vrot.lane.b32.xlu1 %v980_v36, %s3272_s6 }
0x2610   :  { %v2176_v37 = vpop.permute.xlu1 %2175 }
0x2611   :  { %v2178_v38 = vmul.f32 %v3257_v44, %v2176_v37 }
0x2613   :  { %2180 = vrot.lane.b32.xlu0 %v2178_v38, %s3272_s6 }
0x2614   :  { %v2256_v41 = vpop.permute.xlu1 %2255 }
0x2615   :  { %2959 = vmatmul.mubr.msk.f32.vlgmr.msra.gmra.mrb[28].mxu1 %vm168_vm2, %v2256_v41 }
0x2685   :  { %v2181_v46 = vpop.permute.xlu0 %2180 }
0x2686   :  { %2948 = vmatmul.mubr.msk.f32.vlgmr.msra.gmra.mrb[24].mxu0 %vm168_vm2, %v2181_v46 }
0x2687   :  { %3128 = vmatpush3.bf16.msra.mxu0 %v3125_v33  ;;  %2969 = vmatprep.mubr.msk.f32.mxu0 %vm168_vm2, %v3578_v27 }
0x2688   :  { %3130 = vmatprep.subr.bf16.mxu0 %v3129_v2 }
0x268b   :  { %3132 = vmatpush3.bf16.msra.mxu0 %v3129_v2 }
0x268e   :  { %2970 = vmatmul.mubr.msk.f32.vlgmr.msra.gmra.mrb[26].mxu0 %vm168_vm2, %v3593_v49 }
0x268f   :  { %2972 = vmatprep.mubr.msk.f32.mxu0 %vm168_vm2, %v3609_v19  ;;  %v2533_v19 = vld [vmem:[%s3739_s1 + $0x98] ss:$0 sm:$0xff] }
0x2692   :  { %2973 = vmatmul.mubr.msk.f32.gmra.mrb[28].mxu0 %vm168_vm2, %v3625_v28 }
0x2693   :  { %2975 = vmatprep.mubr.msk.f32.mxu0 %vm168_vm2, %v3641_v50 }
0x2696   :  { %2976 = vmatmul.mubr.msk.f32.gmra.mrb[30].mxu0 %vm168_vm2, %v2011_v15 }
0x2697   :  { %2978 = vmatprep.mubr.msk.f32.mxu0 %vm168_vm2, %v2181_v46 }
0x26e8   :  { %v2325_v47 = vpop.f32.mrb[28].mxu1 }
0x26e9   :  { %v2960_v27 = vpop.f32.mrb[29].mxu1 }
0x2759   :  { %v2250_v48 = vpop.f32.mrb[24].mxu0 }
0x275a   :  { %v2326_v51 = vadd.f32 %v2325_v47, %v2250_v48  ;;  %v2949_v52 = vpop.f32.mrb[25].mxu0 }
0x275c   :  { %v2329_v49 = vadd.f32 %v3561_v56, %v2326_v51 }
0x275e   :  { %3260 = vtanh.f32 %v2329_v49  ;;  %v2532_v60 = vmul.f32 -1.442695, %v2329_v49 }
0x2760   :  { %3262 = vpow2.f32 %v2532_v60 }
0x2761   :  { %v2971_v28 = vpop.f32.mrb[26].mxu0 }
0x2762   :  { %v2440_v53 = vadd.f32 %v2971_v28, %v2533_v19  ;;  %v2434_v39 = vpop.f32.mrb[27].mxu0 }
0x2763   :  { %v2435_v50 = vadd.f32 %v2533_v19, %v2434_v39 }
0x2764   :  { %2474 = vst [vmem:[%s3741_s2 + $0x8] sm:$0xff] %v2440_v53 }
0x2765   :  { %2473 = vst [vmem:[%s3741_s2] sm:$0xff] %v2435_v50  ;;  %v2974_v61 = vpop.f32.mrb[28].mxu0 }
0x2766   :  { %v2450_v24 = vadd.f32 %v2974_v61, %v2533_v19  ;;  %v2444_v56 = vpop.f32.mrb[29].mxu0 }
0x2767   :  { %v2445_v43 = vadd.f32 %v2533_v19, %v2444_v56 }
0x2768   :  { %v3261_v55 = vpop.eup %3260  ;;  %2476 = vst [vmem:[%s3741_s2 + $0x18] sm:$0xff] %v2450_v24 }
0x2769   :  { %2475 = vst [vmem:[%s3741_s2 + $0x10] sm:$0xff] %v2445_v43  ;;  %v2977_v16 = vpop.f32.mrb[30].mxu0  ;;  %2339 = vrot.lane.b32.xlu0 %v3261_v55, %s3271_s5 }
0x276a   :  { %v2460_v57 = vadd.f32 %v2977_v16, %v2533_v19  ;;  %v2454_v58 = vpop.f32.mrb[31].mxu0  ;;  %v3263_v3 = vpop.eup %3262 }
0x276b   :  { %v2455_v59 = vadd.f32 %v2533_v19, %v2454_v58  ;;  %v2333_v62 = vadd.f32 1.0, %v3263_v3 }
0x276c   :  { %2478 = vst [vmem:[%s3741_s2 + $0x28] sm:$0xff] %v2460_v57 }
0x276d   :  { %2477 = vst [vmem:[%s3741_s2 + $0x20] sm:$0xff] %v2455_v59  ;;  %3264 = vrcp.f32 %v2333_v62 }
0x2777   :  { %v3265_v63 = vpop.eup %3264 }
0x2778   :  { %v2337_v6 = vmul.f32 %v3265_v63, %v3673_v5 }
0x27db   :  { %v2340_v18 = vpop.permute.xlu0 %2339 }
0x27dc   :  { %v2342_v1 = vmul.f32 %v3265_v63, %v2340_v18 }
0x27de   :  { %2344 = vrot.lane.b32.xlu1 %v2342_v1, %s3272_s6 }
0x2850   :  { %v2345_v4 = vpop.permute.xlu1 %2344 }
0x2851   :  { %v2347_v7 = vadd.f32 %v2345_v4, %v2337_v6 }
0x2853   :  { %3266 = vtanh.f32 %v2347_v7 }
0x285d   :  { %v3267_v13 = vpop.eup %3266 }
0x285e   :  { %2350 = vrot.lane.b32.xlu0 %v3267_v13, %s3271_s5 }
0x28d0   :  { %v2351_v9 = vpop.permute.xlu0 %2350 }
0x28d1   :  { %v2353_v10 = vmul.f32 %v3265_v63, %v2351_v9 }
0x28d3   :  { %2364 = vrot.lane.b32.xlu1 %v2353_v10, %s3272_s6 }
0x2945   :  { %v2365_v15 = vpop.permute.xlu1 %2364 }
0x2946   :  { %2979 = vmatmul.mubr.msk.f32.gmra.mrb[32].mxu0 %vm168_vm2, %v2365_v15 }
0x2a19   :  { %v2980_v54 = vpop.f32.mrb[32].mxu0 }
0x2a1a   :  { %v2470_v11 = vadd.f32 %v2980_v54, %v2533_v19  ;;  %v2464_v12 = vpop.f32.mrb[33].mxu0 }
0x2a1b   :  { %v2465_v17 = vadd.f32 %v2533_v19, %v2464_v12 }
0x2a1c   :  { %2480 = vst [vmem:[%s3741_s2 + $0x38] sm:$0xff] %v2470_v11 }
0x2a1d   :  { %2479 = vst [vmem:[%s3741_s2 + $0x30] sm:$0xff] %v2465_v17 }

</bundles_post_ra>
